<compile_context>
chip_gen: v7x
topology: tpu7x:2x2x1
jax: 0.10.0
libtpu: 0.0.40
codegen_flags: <defaults>
</compile_context>

<pallas_src>
import functools
import math

import jax
import jax.numpy as jnp
from jax import lax
from jax.experimental import pallas as pl
from jax.experimental.pallas import tpu as pltpu


# ----------------------------------------------------------------------------
# In-kernel helpers
# ----------------------------------------------------------------------------
def _layer_norm(x, gamma, beta):
    # LayerNorm over the last dim, eps = 1e-5 (PyTorch default).
    mean = jnp.mean(x, axis=-1, keepdims=True)
    var = jnp.mean(jnp.square(x - mean), axis=-1, keepdims=True)
    return (x - mean) * lax.rsqrt(var + 1e-5) * gamma + beta


def _softmax_rows(s):
    s = s - jnp.max(s, axis=-1, keepdims=True)
    p = jnp.exp(s)
    return p * pl.reciprocal(jnp.sum(p, axis=-1, keepdims=True), approx=True)


# ----------------------------------------------------------------------------
# Pallas kernels
# ----------------------------------------------------------------------------
def _dense_kernel(x_ref, w_ref, b_ref, o_ref):
    # x: [M, K], w: [K, N] (pre-transposed), b: [1, N]
    o_ref[...] = (jnp.dot(x_ref[...], w_ref[...],
                          preferred_element_type=jnp.float32)
                  + b_ref[...]).astype(o_ref.dtype)


def _encoder_layer_kernel(x_ref, m_ref,
                          wqkv_ref, bqkv_ref, wo_ref, bo_ref,
                          g1_ref, be1_ref,
                          w1_ref, b1_ref, w2_ref, b2_ref,
                          g2_ref, be2_ref,
                          o_ref, *, nhead, scale):
    # One grid step == one batch element. Everything below stays in VMEM.
    x = x_ref[0]                                   # [L, d]
    L, d = x.shape
    dh = d // nhead
    mask = m_ref[0]                                # [1, L] additive

    # ---- self attention: combined QKV projection (one wide GEMM) ----
    qkv = jnp.dot(x, wqkv_ref[...], preferred_element_type=jnp.float32) + bqkv_ref[...]
    q = qkv[:, :d] * scale                         # fold 1/sqrt(dh) into q
    k = qkv[:, d:2 * d]
    v = qkv[:, 2 * d:]

    outs = []
    for h in range(nhead):                         # static unroll over heads
        sl = slice(h * dh, (h + 1) * dh)
        q_h = q[:, sl]
        k_h = k[:, sl]
        v_h = v[:, sl]
        s = lax.dot_general(q_h, k_h, (((1,), (1,)), ((), ())),
                            preferred_element_type=jnp.float32)       # [L, L]
        p = _softmax_rows(s + mask)
        outs.append(jnp.dot(p, v_h, preferred_element_type=jnp.float32))
    a = jnp.concatenate(outs, axis=-1)             # [L, d]

    attn = jnp.dot(a, wo_ref[...], preferred_element_type=jnp.float32) + bo_ref[...]
    y = _layer_norm(x + attn, g1_ref[...], be1_ref[...])

    # ---- FFN (lin1 + ReLU + lin2) + add&LN, all fused ----
    hdn = jnp.maximum(
        jnp.dot(y, w1_ref[...], preferred_element_type=jnp.float32) + b1_ref[...], 0.0)
    ff = jnp.dot(hdn, w2_ref[...], preferred_element_type=jnp.float32) + b2_ref[...]
    z = _layer_norm(y + ff, g2_ref[...], be2_ref[...])

    o_ref[0] = z.astype(o_ref.dtype)


def _decoder_layer_kernel(tgt_ref, mem_ref, m_ref,
                          sav_w_ref, sav_b_ref, sao_w_ref, sao_b_ref,
                          g1_ref, be1_ref,
                          caq_w_ref, caq_b_ref, cakv_w_ref, cakv_b_ref,
                          cao_w_ref, cao_b_ref,
                          g2_ref, be2_ref,
                          w1_ref, b1_ref, w2_ref, b2_ref,
                          g3_ref, be3_ref,
                          o_ref, *, nhead, scale):
    # Specialized for a single target token (Lt == 1).
    t = tgt_ref[0]                                 # [1, d]
    mem = mem_ref[0]                               # [L, d]
    mask = m_ref[0]                                # [1, L]
    d = t.shape[-1]
    dh = d // nhead

    # ---- self attention over a single token: softmax over one key == 1,
    #      so the attention output is exactly the V projection. ----
    sa_v = jnp.dot(t, sav_w_ref[...], preferred_element_type=jnp.float32) + sav_b_ref[...]
    sa = jnp.dot(sa_v, sao_w_ref[...], preferred_element_type=jnp.float32) + sao_b_ref[...]
    t1 = _layer_norm(t + sa, g1_ref[...], be1_ref[...])

    # ---- cross attention against memory ----
    q = (jnp.dot(t1, caq_w_ref[...], preferred_element_type=jnp.float32)
         + caq_b_ref[...]) * scale                                      # [1, d]
    kv = jnp.dot(mem, cakv_w_ref[...], preferred_element_type=jnp.float32) + cakv_b_ref[...]
    k = kv[:, :d]                                                       # [L, d]
    v = kv[:, d:]                                                       # [L, d]

    outs = []
    for h in range(nhead):
        sl = slice(h * dh, (h + 1) * dh)
        q_h = q[:, sl]                                                  # [1, dh]
        k_h = k[:, sl]                                                  # [L, dh]
        v_h = v[:, sl]
        s = lax.dot_general(q_h, k_h, (((1,), (1,)), ((), ())),
                            preferred_element_type=jnp.float32)         # [1, L]
        p = _softmax_rows(s + mask)
        outs.append(jnp.dot(p, v_h, preferred_element_type=jnp.float32))
    a = jnp.concatenate(outs, axis=-1)                                  # [1, d]

    ca = jnp.dot(a, cao_w_ref[...], preferred_element_type=jnp.float32) + cao_b_ref[...]
    t2 = _layer_norm(t1 + ca, g2_ref[...], be2_ref[...])

    # ---- FFN + add&LN ----
    hdn = jnp.maximum(
        jnp.dot(t2, w1_ref[...], preferred_element_type=jnp.float32) + b1_ref[...], 0.0)
    ff = jnp.dot(hdn, w2_ref[...], preferred_element_type=jnp.float32) + b2_ref[...]
    t3 = _layer_norm(t2 + ff, g3_ref[...], be3_ref[...])

    o_ref[0] = t3.astype(o_ref.dtype)


# ----------------------------------------------------------------------------
# pallas_call wrappers
# ----------------------------------------------------------------------------
def _full_spec(*shape):
    # Whole-array block, constant index_map (weights / broadcast params).
    return pl.BlockSpec(shape, lambda b, _n=len(shape): (0,) * _n)


def dense(x2d, w_t, b_row):
    M, K = x2d.shape
    N = w_t.shape[1]
    return pl.pallas_call(
        _dense_kernel,
        out_shape=jax.ShapeDtypeStruct((M, N), jnp.float32),
        grid=(1,),
        in_specs=[
            pl.BlockSpec((M, K), lambda i: (0, 0)),
            pl.BlockSpec((K, N), lambda i: (0, 0)),
            pl.BlockSpec((1, N), lambda i: (0, 0)),
        ],
        out_specs=pl.BlockSpec((M, N), lambda i: (0, 0)),
    )(x2d, w_t, b_row)


def encoder_layer(x, mask_add, p, nhead):
    B, L, d = x.shape
    dff = p["w1"].shape[1]
    scale = 1.0 / math.sqrt(d // nhead)
    kern = functools.partial(_encoder_layer_kernel, nhead=nhead, scale=scale)
    return pl.pallas_call(
        kern,
        out_shape=jax.ShapeDtypeStruct((B, L, d), jnp.float32),
        grid=(B,),
        in_specs=[
            pl.BlockSpec((1, L, d), lambda b: (b, 0, 0)),   # x
            pl.BlockSpec((1, 1, L), lambda b: (b, 0, 0)),   # additive mask
            _full_spec(d, 3 * d), _full_spec(1, 3 * d),     # qkv proj
            _full_spec(d, d), _full_spec(1, d),             # out proj
            _full_spec(1, d), _full_spec(1, d),             # LN1
            _full_spec(d, dff), _full_spec(1, dff),         # lin1
            _full_spec(dff, d), _full_spec(1, d),           # lin2
            _full_spec(1, d), _full_spec(1, d),             # LN2
        ],
        out_specs=pl.BlockSpec((1, L, d), lambda b: (b, 0, 0)),
        compiler_params=pltpu.CompilerParams(dimension_semantics=("parallel",)),
    )(x, mask_add,
      p["w_qkv"], p["b_qkv"], p["w_o"], p["b_o"],
      p["ln1_g"], p["ln1_b"],
      p["w1"], p["b1"], p["w2"], p["b2"],
      p["ln2_g"], p["ln2_b"])


def decoder_layer(tgt, memory, mask_add, p, nhead):
    B, Lt, d = tgt.shape        # Lt == 1 for this model
    L = memory.shape[1]
    dff = p["w1"].shape[1]
    scale = 1.0 / math.sqrt(d // nhead)
    kern = functools.partial(_decoder_layer_kernel, nhead=nhead, scale=scale)
    return pl.pallas_call(
        kern,
        out_shape=jax.ShapeDtypeStruct((B, 1, d), jnp.float32),
        grid=(B,),
        in_specs=[
            pl.BlockSpec((1, 1, d), lambda b: (b, 0, 0)),   # tgt token
            pl.BlockSpec((1, L, d), lambda b: (b, 0, 0)),   # memory
            pl.BlockSpec((1, 1, L), lambda b: (b, 0, 0)),   # additive mask
            _full_spec(d, d), _full_spec(1, d),             # self-attn V proj
            _full_spec(d, d), _full_spec(1, d),             # self-attn out proj
            _full_spec(1, d), _full_spec(1, d),             # LN1
            _full_spec(d, d), _full_spec(1, d),             # cross-attn Q proj
            _full_spec(d, 2 * d), _full_spec(1, 2 * d),     # cross-attn KV proj
            _full_spec(d, d), _full_spec(1, d),             # cross-attn out proj
            _full_spec(1, d), _full_spec(1, d),             # LN2
            _full_spec(d, dff), _full_spec(1, dff),         # lin1
            _full_spec(dff, d), _full_spec(1, d),           # lin2
            _full_spec(1, d), _full_spec(1, d),             # LN3
        ],
        out_specs=pl.BlockSpec((1, 1, d), lambda b: (b, 0, 0)),
        compiler_params=pltpu.CompilerParams(dimension_semantics=("parallel",)),
    )(tgt, memory, mask_add,
      p["sa_w_v"], p["sa_b_v"], p["sa_w_o"], p["sa_b_o"],
      p["ln1_g"], p["ln1_b"],
      p["ca_w_q"], p["ca_b_q"], p["ca_w_kv"], p["ca_b_kv"], p["ca_w_o"], p["ca_b_o"],
      p["ln2_g"], p["ln2_b"],
      p["w1"], p["b1"], p["w2"], p["b2"],
      p["ln3_g"], p["ln3_b"])


# ----------------------------------------------------------------------------
# Forward pass
# ----------------------------------------------------------------------------
def transformer_oh_forward(kparams, src, src_key_padding_mask, *, nhead):
    B, L, Din = src.shape
    d = kparams["linear_w"].shape[1]

    # src = self.linear(src)
    x = dense(src.reshape(B * L, Din), kparams["linear_w"], kparams["linear_b"])
    memory = x.reshape(B, L, d)

    # Additive key-padding mask, shared by all heads / layers: [B, 1, L].
    # TODO(synk): PyTorch uses -inf (NaN on fully-padded rows); -1e9 keeps finiteness.
    mask_add = jnp.where(src_key_padding_mask, -1e9, 0.0).astype(jnp.float32)[:, None, :]

    # memory = self.encoder(src, src_key_padding_mask=...)
    for lp in kparams["encoder_layers"]:
        memory = encoder_layer(memory, mask_add, lp, nhead)

    # tgt = self.embedding(zeros([B, 1]).long())  -> row 0 of the embedding table
    tgt = jnp.broadcast_to(kparams["embedding"][0][None, None, :], (B, 1, d))

    # out = self.decoder(tgt, memory, memory_key_padding_mask=...)
    out = tgt
    for lp in kparams["decoder_layers"]:
        out = decoder_layer(out, memory, mask_add, lp, nhead)

    # out = out.squeeze(1); out = self.classifier(out)
    logits = dense(out[:, 0, :], kparams["cls_w"], kparams["cls_b"])
    return logits


# ----------------------------------------------------------------------------
# Parameters: init in PyTorch layout, then one-time conversion to kernel layout
# (weights transposed to [K, N], QKV/KV combined, biases as [1, N] rows).
# ----------------------------------------------------------------------------
def init_params(key, d_in, d_model, nhead, dim_ff, num_enc, num_dec, vocab, num_classes):
    keys = iter(jax.random.split(key, 256))

    def w(shape, scale=0.05):
        return scale * jax.random.normal(next(keys), shape, jnp.float32)

    def mha_params():
        return {
            "in_proj_weight": w((3 * d_model, d_model)),
            "in_proj_bias": w((3 * d_model,)),
            "out_proj_weight": w((d_model, d_model)),
            "out_proj_bias": w((d_model,)),
        }

    def enc_layer():
        return {
            "self_attn": mha_params(),
            "lin1_w": w((dim_ff, d_model)), "lin1_b": w((dim_ff,)),
            "lin2_w": w((d_model, dim_ff)), "lin2_b": w((d_model,)),
            "norm1_w": jnp.ones((d_model,), jnp.float32), "norm1_b": jnp.zeros((d_model,), jnp.float32),
            "norm2_w": jnp.ones((d_model,), jnp.float32), "norm2_b": jnp.zeros((d_model,), jnp.float32),
        }

    def dec_layer():
        return {
            "self_attn": mha_params(),
            "cross_attn": mha_params(),
            "lin1_w": w((dim_ff, d_model)), "lin1_b": w((dim_ff,)),
            "lin2_w": w((d_model, dim_ff)), "lin2_b": w((d_model,)),
            "norm1_w": jnp.ones((d_model,), jnp.float32), "norm1_b": jnp.zeros((d_model,), jnp.float32),
            "norm2_w": jnp.ones((d_model,), jnp.float32), "norm2_b": jnp.zeros((d_model,), jnp.float32),
            "norm3_w": jnp.ones((d_model,), jnp.float32), "norm3_b": jnp.zeros((d_model,), jnp.float32),
        }

    return {
        "linear_w": w((d_model, d_in)), "linear_b": w((d_model,)),
        "encoder_layers": [enc_layer() for _ in range(num_enc)],
        "decoder_layers": [dec_layer() for _ in range(num_dec)],
        "embedding": w((vocab, d_model)),
        "cls_w": w((num_classes, d_model)), "cls_b": w((num_classes,)),
    }


def prepare_params(p):
    """One-time conversion: PyTorch [N, K] weights -> kernel [K, N] layout."""
    def row(b):
        return b.reshape(1, -1)

    def enc(lp):
        sa = lp["self_attn"]
        return {
            "w_qkv": sa["in_proj_weight"].T, "b_qkv": row(sa["in_proj_bias"]),
            "w_o": sa["out_proj_weight"].T, "b_o": row(sa["out_proj_bias"]),
            "ln1_g": row(lp["norm1_w"]), "ln1_b": row(lp["norm1_b"]),
            "w1": lp["lin1_w"].T, "b1": row(lp["lin1_b"]),
            "w2": lp["lin2_w"].T, "b2": row(lp["lin2_b"]),
            "ln2_g": row(lp["norm2_w"]), "ln2_b": row(lp["norm2_b"]),
        }

    def dec(lp):
        d = lp["norm1_w"].shape[0]
        sa_w, sa_b = lp["self_attn"]["in_proj_weight"], lp["self_attn"]["in_proj_bias"]
        ca_w, ca_b = lp["cross_attn"]["in_proj_weight"], lp["cross_attn"]["in_proj_bias"]
        return {
            # single-token self-attention only ever needs the V projection
            "sa_w_v": sa_w[2 * d:].T, "sa_b_v": row(sa_b[2 * d:]),
            "sa_w_o": lp["self_attn"]["out_proj_weight"].T,
            "sa_b_o": row(lp["self_attn"]["out_proj_bias"]),
            "ln1_g": row(lp["norm1_w"]), "ln1_b": row(lp["norm1_b"]),
            "ca_w_q": ca_w[:d].T, "ca_b_q": row(ca_b[:d]),
            "ca_w_kv": ca_w[d:].T, "ca_b_kv": row(ca_b[d:]),
            "ca_w_o": lp["cross_attn"]["out_proj_weight"].T,
            "ca_b_o": row(lp["cross_attn"]["out_proj_bias"]),
            "ln2_g": row(lp["norm2_w"]), "ln2_b": row(lp["norm2_b"]),
            "w1": lp["lin1_w"].T, "b1": row(lp["lin1_b"]),
            "w2": lp["lin2_w"].T, "b2": row(lp["lin2_b"]),
            "ln3_g": row(lp["norm3_w"]), "ln3_b": row(lp["norm3_b"]),
        }

    return {
        "linear_w": p["linear_w"].T, "linear_b": row(p["linear_b"]),
        "encoder_layers": [enc(lp) for lp in p["encoder_layers"]],
        "decoder_layers": [dec(lp) for lp in p["decoder_layers"]],
        "embedding": p["embedding"],
        "cls_w": p["cls_w"].T, "cls_b": row(p["cls_b"]),
    }


# ----------------------------------------------------------------------------
if __name__ == "__main__":
    B, L, D_in = 2, 8, 16
    d_model, nhead, dim_ff = 32, 4, 64
    num_enc, num_dec = 1, 1
    vocab, num_classes = 12, 10

    key = jax.random.PRNGKey(0)
    k_params, k_src = jax.random.split(key)

    pt_params = init_params(k_params, D_in, d_model, nhead, dim_ff,
                            num_enc, num_dec, vocab, num_classes)
    kparams = prepare_params(pt_params)   # one-time [K,N] weight layout prep

    src = jax.random.normal(k_src, (B, L, D_in), jnp.float32)
    # key padding mask: True = padded position (last 2 positions padded)
    src_key_padding_mask = jnp.zeros((B, L), jnp.bool_).at[:, -2:].set(True)

    fwd = jax.jit(functools.partial(transformer_oh_forward, nhead=nhead))
    out = fwd(kparams, src, src_key_padding_mask)
    jax.block_until_ready(out)

    assert out.shape == (B, num_classes), out.shape
    assert jnp.all(jnp.isfinite(out))
    print("KERNEL_OK")
</pallas_src>

<mosaic_0001>
module attributes {stable_mosaic.version = 11 : i64} {
  func.func @_dense_kernel(%arg0: i32, %arg1: memref<16x16xf32, #tpu.memory_space<vmem>>, %arg2: memref<16x32xf32, #tpu.memory_space<vmem>>, %arg3: memref<1x32xf32, #tpu.memory_space<vmem>>, %arg4: memref<16x32xf32, #tpu.memory_space<vmem>>) attributes {dimension_semantics = [#tpu.dimension_semantics<arbitrary>], iteration_bounds = array<i64: 1>, scalar_prefetch = 0 : i64, scratch_operands = 0 : i64, tpu.core_type = #tpu.core_type<tc>, window_params = [{pipeline_mode = #tpu.pipeline_mode<synchronous>, transform_indices = @transform_0, window_bounds = array<i64: 16, 16>}, {pipeline_mode = #tpu.pipeline_mode<synchronous>, transform_indices = @transform_1, window_bounds = array<i64: 16, 32>}, {pipeline_mode = #tpu.pipeline_mode<synchronous>, transform_indices = @transform_2, window_bounds = array<i64: 1, 32>}, {pipeline_mode = #tpu.pipeline_mode<synchronous>, transform_indices = @transform_3, window_bounds = array<i64: 16, 32>}]} {
    %c0 = arith.constant 0 : index
    %c0_0 = arith.constant 0 : index
    %0 = vector.load %arg1[%c0, %c0_0] : memref<16x16xf32, #tpu.memory_space<vmem>>, vector<16x16xf32>
    %c0_1 = arith.constant 0 : index
    %c0_2 = arith.constant 0 : index
    %1 = vector.load %arg2[%c0_1, %c0_2] : memref<16x32xf32, #tpu.memory_space<vmem>>, vector<16x32xf32>
    %cst = arith.constant dense<0.000000e+00> : vector<16x32xf32>
    %2 = tpu.matmul %0, %1, %cst {dimension_numbers = #tpu.dot_dimension_numbers<[1], [0], [0], [1], [0, 0, 1, 1], [], []>} : vector<16x16xf32>, vector<16x32xf32>, vector<16x32xf32> -> vector<16x32xf32>
    %c0_3 = arith.constant 0 : index
    %c0_4 = arith.constant 0 : index
    %3 = vector.load %arg3[%c0_3, %c0_4] : memref<1x32xf32, #tpu.memory_space<vmem>>, vector<1x32xf32>
    %4 = vector.broadcast %3 : vector<1x32xf32> to vector<16x32xf32>
    %5 = arith.addf %2, %4 : vector<16x32xf32>
    %c0_5 = arith.constant 0 : index
    %c0_6 = arith.constant 0 : index
    %6 = vector.load %arg4[%c0_5, %c0_6] : memref<16x32xf32, #tpu.memory_space<vmem>>, vector<16x32xf32>
    tpu.vector_store %arg4[%c0_5, %c0_6], %5 {strides = array<i32>} : memref<16x32xf32, #tpu.memory_space<vmem>>, vector<16x32xf32>,
    return
  }
  func.func @transform_0(%arg0: i32) -> (i32, i32) {
    %c0_i32 = arith.constant 0 : i32
    %c0_i32_0 = arith.constant 0 : i32
    %c0_i32_1 = arith.constant 0 : i32
    return %c0_i32, %c0_i32_0 : i32, i32
  }
  func.func @transform_1(%arg0: i32) -> (i32, i32) {
    %c0_i32 = arith.constant 0 : i32
    %c0_i32_0 = arith.constant 0 : i32
    %c0_i32_1 = arith.constant 0 : i32
    return %c0_i32, %c0_i32_0 : i32, i32
  }
  func.func @transform_2(%arg0: i32) -> (i32, i32) {
    %c0_i32 = arith.constant 0 : i32
    %c0_i32_0 = arith.constant 0 : i32
    %c0_i32_1 = arith.constant 0 : i32
    return %c0_i32, %c0_i32_0 : i32, i32
  }
  func.func @transform_3(%arg0: i32) -> (i32, i32) {
    %c0_i32 = arith.constant 0 : i32
    %c0_i32_0 = arith.constant 0 : i32
    %c0_i32_1 = arith.constant 0 : i32
    return %c0_i32, %c0_i32_0 : i32, i32
  }
}

module attributes {stable_mosaic.version = 11 : i64} {
  func.func @_encoder_layer_kernel(%arg0: i32, %arg1: memref<1x8x32xf32, #tpu.memory_space<vmem>>, %arg2: memref<1x1x8xf32, #tpu.memory_space<vmem>>, %arg3: memref<32x96xf32, #tpu.memory_space<vmem>>, %arg4: memref<1x96xf32, #tpu.memory_space<vmem>>, %arg5: memref<32x32xf32, #tpu.memory_space<vmem>>, %arg6: memref<1x32xf32, #tpu.memory_space<vmem>>, %arg7: memref<1x32xf32, #tpu.memory_space<vmem>>, %arg8: memref<1x32xf32, #tpu.memory_space<vmem>>, %arg9: memref<32x64xf32, #tpu.memory_space<vmem>>, %arg10: memref<1x64xf32, #tpu.memory_space<vmem>>, %arg11: memref<64x32xf32, #tpu.memory_space<vmem>>, %arg12: memref<1x32xf32, #tpu.memory_space<vmem>>, %arg13: memref<1x32xf32, #tpu.memory_space<vmem>>, %arg14: memref<1x32xf32, #tpu.memory_space<vmem>>, %arg15: memref<1x8x32xf32, #tpu.memory_space<vmem>>) attributes {dimension_semantics = [#tpu.dimension_semantics<parallel>], iteration_bounds = array<i64: 2>, scalar_prefetch = 0 : i64, scratch_operands = 0 : i64, tpu.core_type = #tpu.core_type<tc>, window_params = [{transform_indices = @transform_0, window_bounds = array<i64: 1, 8, 32>}, {transform_indices = @transform_1, window_bounds = array<i64: 1, 1, 8>}, {pipeline_mode = #tpu.pipeline_mode<synchronous>, transform_indices = @transform_2, window_bounds = array<i64: 32, 96>}, {pipeline_mode = #tpu.pipeline_mode<synchronous>, transform_indices = @transform_3, window_bounds = array<i64: 1, 96>}, {pipeline_mode = #tpu.pipeline_mode<synchronous>, transform_indices = @transform_4, window_bounds = array<i64: 32, 32>}, {pipeline_mode = #tpu.pipeline_mode<synchronous>, transform_indices = @transform_5, window_bounds = array<i64: 1, 32>}, {pipeline_mode = #tpu.pipeline_mode<synchronous>, transform_indices = @transform_6, window_bounds = array<i64: 1, 32>}, {pipeline_mode = #tpu.pipeline_mode<synchronous>, transform_indices = @transform_7, window_bounds = array<i64: 1, 32>}, {pipeline_mode = #tpu.pipeline_mode<synchronous>, transform_indices = @transform_8, window_bounds = array<i64: 32, 64>}, {pipeline_mode = #tpu.pipeline_mode<synchronous>, transform_indices = @transform_9, window_bounds = array<i64: 1, 64>}, {pipeline_mode = #tpu.pipeline_mode<synchronous>, transform_indices = @transform_10, window_bounds = array<i64: 64, 32>}, {pipeline_mode = #tpu.pipeline_mode<synchronous>, transform_indices = @transform_11, window_bounds = array<i64: 1, 32>}, {pipeline_mode = #tpu.pipeline_mode<synchronous>, transform_indices = @transform_12, window_bounds = array<i64: 1, 32>}, {pipeline_mode = #tpu.pipeline_mode<synchronous>, transform_indices = @transform_13, window_bounds = array<i64: 1, 32>}, {transform_indices = @transform_14, window_bounds = array<i64: 1, 8, 32>}]} {
    %c0 = arith.constant 0 : index
    %c0_0 = arith.constant 0 : index
    %c0_1 = arith.constant 0 : index
    %0 = vector.load %arg1[%c0, %c0_0, %c0_1] : memref<1x8x32xf32, #tpu.memory_space<vmem>>, vector<1x8x32xf32>
    %1 = vector.shape_cast %0 : vector<1x8x32xf32> to vector<8x32xf32>
    %c0_2 = arith.constant 0 : index
    %c0_3 = arith.constant 0 : index
    %c0_4 = arith.constant 0 : index
    %2 = vector.load %arg2[%c0_2, %c0_3, %c0_4] : memref<1x1x8xf32, #tpu.memory_space<vmem>>, vector<1x1x8xf32>
    %3 = vector.shape_cast %2 : vector<1x1x8xf32> to vector<1x8xf32>
    %c0_5 = arith.constant 0 : index
    %c0_6 = arith.constant 0 : index
    %4 = vector.load %arg3[%c0_5, %c0_6] : memref<32x96xf32, #tpu.memory_space<vmem>>, vector<32x96xf32>
    %cst = arith.constant dense<0.000000e+00> : vector<8x96xf32>
    %5 = tpu.matmul %1, %4, %cst {dimension_numbers = #tpu.dot_dimension_numbers<[1], [0], [0], [1], [0, 0, 1, 1], [], []>} : vector<8x32xf32>, vector<32x96xf32>, vector<8x96xf32> -> vector<8x96xf32>
    %c0_7 = arith.constant 0 : index
    %c0_8 = arith.constant 0 : index
    %6 = vector.load %arg4[%c0_7, %c0_8] : memref<1x96xf32, #tpu.memory_space<vmem>>, vector<1x96xf32>
    %7 = vector.broadcast %6 : vector<1x96xf32> to vector<8x96xf32>
    %8 = arith.addf %5, %7 : vector<8x96xf32>
    %9 = vector.extract_strided_slice %8 {offsets = [0, 0], sizes = [8, 32], strides = [1, 1]} : vector<8x96xf32> to vector<8x32xf32>
    %cst_9 = arith.constant 0.353553385 : f32
    %10 = vector.broadcast %cst_9 : f32 to vector<8x32xf32>
    %11 = arith.mulf %9, %10 : vector<8x32xf32>
    %12 = vector.extract_strided_slice %8 {offsets = [0, 32], sizes = [8, 32], strides = [1, 1]} : vector<8x96xf32> to vector<8x32xf32>
    %13 = vector.extract_strided_slice %8 {offsets = [0, 64], sizes = [8, 32], strides = [1, 1]} : vector<8x96xf32> to vector<8x32xf32>
    %14 = vector.extract_strided_slice %11 {offsets = [0, 0], sizes = [8, 8], strides = [1, 1]} : vector<8x32xf32> to vector<8x8xf32>
    %15 = vector.extract_strided_slice %12 {offsets = [0, 0], sizes = [8, 8], strides = [1, 1]} : vector<8x32xf32> to vector<8x8xf32>
    %16 = vector.extract_strided_slice %13 {offsets = [0, 0], sizes = [8, 8], strides = [1, 1]} : vector<8x32xf32> to vector<8x8xf32>
    %cst_10 = arith.constant dense<0.000000e+00> : vector<8x8xf32>
    %17 = tpu.matmul %14, %15, %cst_10 {dimension_numbers = #tpu.dot_dimension_numbers<[1], [1], [0], [0], [0, 0, 1, 0], [], []>} : vector<8x8xf32>, vector<8x8xf32>, vector<8x8xf32> -> vector<8x8xf32>
    %18 = vector.broadcast %3 : vector<1x8xf32> to vector<8x8xf32>
    %19 = arith.addf %17, %18 : vector<8x8xf32>
    %cst_11 = arith.constant dense<0xFF800000> : vector<8xf32>
    %20 = vector.multi_reduction <maximumf>, %19, %cst_11 [1] : vector<8x8xf32> to vector<8xf32>
    %21 = vector.shape_cast %20 : vector<8xf32> to vector<8x1xf32>
    %22 = vector.broadcast %21 : vector<8x1xf32> to vector<8x8xf32>
    %23 = arith.subf %19, %22 : vector<8x8xf32>
    %24 = math.exp %23 : vector<8x8xf32>
    %cst_12 = arith.constant dense<0.000000e+00> : vector<8xf32>
    %25 = vector.multi_reduction <add>, %24, %cst_12 [1] : vector<8x8xf32> to vector<8xf32>
    %26 = vector.shape_cast %25 : vector<8xf32> to vector<8x1xf32>
    %27 = tpu.reciprocal %26 {approx = true} : vector<8x1xf32> -> vector<8x1xf32>
    %28 = vector.broadcast %27 : vector<8x1xf32> to vector<8x8xf32>
    %29 = arith.mulf %24, %28 : vector<8x8xf32>
    %cst_13 = arith.constant dense<0.000000e+00> : vector<8x8xf32>
    %30 = tpu.matmul %29, %16, %cst_13 {dimension_numbers = #tpu.dot_dimension_numbers<[1], [0], [0], [1], [0, 0, 1, 1], [], []>} : vector<8x8xf32>, vector<8x8xf32>, vector<8x8xf32> -> vector<8x8xf32>
    %31 = vector.extract_strided_slice %11 {offsets = [0, 8], sizes = [8, 8], strides = [1, 1]} : vector<8x32xf32> to vector<8x8xf32>
    %32 = vector.extract_strided_slice %12 {offsets = [0, 8], sizes = [8, 8], strides = [1, 1]} : vector<8x32xf32> to vector<8x8xf32>
    %33 = vector.extract_strided_slice %13 {offsets = [0, 8], sizes = [8, 8], strides = [1, 1]} : vector<8x32xf32> to vector<8x8xf32>
    %cst_14 = arith.constant dense<0.000000e+00> : vector<8x8xf32>
    %34 = tpu.matmul %31, %32, %cst_14 {dimension_numbers = #tpu.dot_dimension_numbers<[1], [1], [0], [0], [0, 0, 1, 0], [], []>} : vector<8x8xf32>, vector<8x8xf32>, vector<8x8xf32> -> vector<8x8xf32>
    %35 = vector.broadcast %3 : vector<1x8xf32> to vector<8x8xf32>
    %36 = arith.addf %34, %35 : vector<8x8xf32>
    %cst_15 = arith.constant dense<0xFF800000> : vector<8xf32>
    %37 = vector.multi_reduction <maximumf>, %36, %cst_15 [1] : vector<8x8xf32> to vector<8xf32>
    %38 = vector.shape_cast %37 : vector<8xf32> to vector<8x1xf32>
    %39 = vector.broadcast %38 : vector<8x1xf32> to vector<8x8xf32>
    %40 = arith.subf %36, %39 : vector<8x8xf32>
    %41 = math.exp %40 : vector<8x8xf32>
    %cst_16 = arith.constant dense<0.000000e+00> : vector<8xf32>
    %42 = vector.multi_reduction <add>, %41, %cst_16 [1] : vector<8x8xf32> to vector<8xf32>
    %43 = vector.shape_cast %42 : vector<8xf32> to vector<8x1xf32>
    %44 = tpu.reciprocal %43 {approx = true} : vector<8x1xf32> -> vector<8x1xf32>
    %45 = vector.broadcast %44 : vector<8x1xf32> to vector<8x8xf32>
    %46 = arith.mulf %41, %45 : vector<8x8xf32>
    %cst_17 = arith.constant dense<0.000000e+00> : vector<8x8xf32>
    %47 = tpu.matmul %46, %33, %cst_17 {dimension_numbers = #tpu.dot_dimension_numbers<[1], [0], [0], [1], [0, 0, 1, 1], [], []>} : vector<8x8xf32>, vector<8x8xf32>, vector<8x8xf32> -> vector<8x8xf32>
    %48 = vector.extract_strided_slice %11 {offsets = [0, 16], sizes = [8, 8], strides = [1, 1]} : vector<8x32xf32> to vector<8x8xf32>
    %49 = vector.extract_strided_slice %12 {offsets = [0, 16], sizes = [8, 8], strides = [1, 1]} : vector<8x32xf32> to vector<8x8xf32>
    %50 = vector.extract_strided_slice %13 {offsets = [0, 16], sizes = [8, 8], strides = [1, 1]} : vector<8x32xf32> to vector<8x8xf32>
    %cst_18 = arith.constant dense<0.000000e+00> : vector<8x8xf32>
    %51 = tpu.matmul %48, %49, %cst_18 {dimension_numbers = #tpu.dot_dimension_numbers<[1], [1], [0], [0], [0, 0, 1, 0], [], []>} : vector<8x8xf32>, vector<8x8xf32>, vector<8x8xf32> -> vector<8x8xf32>
    %52 = vector.broadcast %3 : vector<1x8xf32> to vector<8x8xf32>
    %53 = arith.addf %51, %52 : vector<8x8xf32>
    %cst_19 = arith.constant dense<0xFF800000> : vector<8xf32>
    %54 = vector.multi_reduction <maximumf>, %53, %cst_19 [1] : vector<8x8xf32> to vector<8xf32>
    %55 = vector.shape_cast %54 : vector<8xf32> to vector<8x1xf32>
    %56 = vector.broadcast %55 : vector<8x1xf32> to vector<8x8xf32>
    %57 = arith.subf %53, %56 : vector<8x8xf32>
    %58 = math.exp %57 : vector<8x8xf32>
    %cst_20 = arith.constant dense<0.000000e+00> : vector<8xf32>
    %59 = vector.multi_reduction <add>, %58, %cst_20 [1] : vector<8x8xf32> to vector<8xf32>
    %60 = vector.shape_cast %59 : vector<8xf32> to vector<8x1xf32>
    %61 = tpu.reciprocal %60 {approx = true} : vector<8x1xf32> -> vector<8x1xf32>
    %62 = vector.broadcast %61 : vector<8x1xf32> to vector<8x8xf32>
    %63 = arith.mulf %58, %62 : vector<8x8xf32>
    %cst_21 = arith.constant dense<0.000000e+00> : vector<8x8xf32>
    %64 = tpu.matmul %63, %50, %cst_21 {dimension_numbers = #tpu.dot_dimension_numbers<[1], [0], [0], [1], [0, 0, 1, 1], [], []>} : vector<8x8xf32>, vector<8x8xf32>, vector<8x8xf32> -> vector<8x8xf32>
    %65 = vector.extract_strided_slice %11 {offsets = [0, 24], sizes = [8, 8], strides = [1, 1]} : vector<8x32xf32> to vector<8x8xf32>
    %66 = vector.extract_strided_slice %12 {offsets = [0, 24], sizes = [8, 8], strides = [1, 1]} : vector<8x32xf32> to vector<8x8xf32>
    %67 = vector.extract_strided_slice %13 {offsets = [0, 24], sizes = [8, 8], strides = [1, 1]} : vector<8x32xf32> to vector<8x8xf32>
    %cst_22 = arith.constant dense<0.000000e+00> : vector<8x8xf32>
    %68 = tpu.matmul %65, %66, %cst_22 {dimension_numbers = #tpu.dot_dimension_numbers<[1], [1], [0], [0], [0, 0, 1, 0], [], []>} : vector<8x8xf32>, vector<8x8xf32>, vector<8x8xf32> -> vector<8x8xf32>
    %69 = vector.broadcast %3 : vector<1x8xf32> to vector<8x8xf32>
    %70 = arith.addf %68, %69 : vector<8x8xf32>
    %cst_23 = arith.constant dense<0xFF800000> : vector<8xf32>
    %71 = vector.multi_reduction <maximumf>, %70, %cst_23 [1] : vector<8x8xf32> to vector<8xf32>
    %72 = vector.shape_cast %71 : vector<8xf32> to vector<8x1xf32>
    %73 = vector.broadcast %72 : vector<8x1xf32> to vector<8x8xf32>
    %74 = arith.subf %70, %73 : vector<8x8xf32>
    %75 = math.exp %74 : vector<8x8xf32>
    %cst_24 = arith.constant dense<0.000000e+00> : vector<8xf32>
    %76 = vector.multi_reduction <add>, %75, %cst_24 [1] : vector<8x8xf32> to vector<8xf32>
    %77 = vector.shape_cast %76 : vector<8xf32> to vector<8x1xf32>
    %78 = tpu.reciprocal %77 {approx = true} : vector<8x1xf32> -> vector<8x1xf32>
    %79 = vector.broadcast %78 : vector<8x1xf32> to vector<8x8xf32>
    %80 = arith.mulf %75, %79 : vector<8x8xf32>
    %cst_25 = arith.constant dense<0.000000e+00> : vector<8x8xf32>
    %81 = tpu.matmul %80, %67, %cst_25 {dimension_numbers = #tpu.dot_dimension_numbers<[1], [0], [0], [1], [0, 0, 1, 1], [], []>} : vector<8x8xf32>, vector<8x8xf32>, vector<8x8xf32> -> vector<8x8xf32>
    %82 = tpu.concatenate %30, %47, %64, %81 in 1 : vector<8x8xf32>, vector<8x8xf32>, vector<8x8xf32>, vector<8x8xf32> -> vector<8x32xf32>
    %c0_26 = arith.constant 0 : index
    %c0_27 = arith.constant 0 : index
    %83 = vector.load %arg5[%c0_26, %c0_27] : memref<32x32xf32, #tpu.memory_space<vmem>>, vector<32x32xf32>
    %cst_28 = arith.constant dense<0.000000e+00> : vector<8x32xf32>
    %84 = tpu.matmul %82, %83, %cst_28 {dimension_numbers = #tpu.dot_dimension_numbers<[1], [0], [0], [1], [0, 0, 1, 1], [], []>} : vector<8x32xf32>, vector<32x32xf32>, vector<8x32xf32> -> vector<8x32xf32>
    %c0_29 = arith.constant 0 : index
    %c0_30 = arith.constant 0 : index
    %85 = vector.load %arg6[%c0_29, %c0_30] : memref<1x32xf32, #tpu.memory_space<vmem>>, vector<1x32xf32>
    %86 = vector.broadcast %85 : vector<1x32xf32> to vector<8x32xf32>
    %87 = arith.addf %84, %86 : vector<8x32xf32>
    %88 = arith.addf %1, %87 : vector<8x32xf32>
    %c0_31 = arith.constant 0 : index
    %c0_32 = arith.constant 0 : index
    %89 = vector.load %arg7[%c0_31, %c0_32] : memref<1x32xf32, #tpu.memory_space<vmem>>, vector<1x32xf32>
    %c0_33 = arith.constant 0 : index
    %c0_34 = arith.constant 0 : index
    %90 = vector.load %arg8[%c0_33, %c0_34] : memref<1x32xf32, #tpu.memory_space<vmem>>, vector<1x32xf32>
    %cst_35 = arith.constant dense<0.000000e+00> : vector<8xf32>
    %91 = vector.multi_reduction <add>, %88, %cst_35 [1] : vector<8x32xf32> to vector<8xf32>
    %92 = vector.shape_cast %91 : vector<8xf32> to vector<8x1xf32>
    %cst_36 = arith.constant 3.200000e+01 : f32
    %93 = vector.broadcast %cst_36 : f32 to vector<8x1xf32>
    %94 = arith.divf %92, %93 : vector<8x1xf32>
    %95 = vector.broadcast %94 : vector<8x1xf32> to vector<8x32xf32>
    %96 = arith.subf %88, %95 : vector<8x32xf32>
    %97 = arith.mulf %96, %96 : vector<8x32xf32>
    %cst_37 = arith.constant dense<0.000000e+00> : vector<8xf32>
    %98 = vector.multi_reduction <add>, %97, %cst_37 [1] : vector<8x32xf32> to vector<8xf32>
    %99 = vector.shape_cast %98 : vector<8xf32> to vector<8x1xf32>
    %cst_38 = arith.constant 3.200000e+01 : f32
    %100 = vector.broadcast %cst_38 : f32 to vector<8x1xf32>
    %101 = arith.divf %99, %100 : vector<8x1xf32>
    %102 = vector.broadcast %94 : vector<8x1xf32> to vector<8x32xf32>
    %103 = arith.subf %88, %102 : vector<8x32xf32>
    %cst_39 = arith.constant 9.99999974E-6 : f32
    %104 = vector.broadcast %cst_39 : f32 to vector<8x1xf32>
    %105 = arith.addf %101, %104 : vector<8x1xf32>
    %106 = math.rsqrt %105 : vector<8x1xf32>
    %107 = vector.broadcast %106 : vector<8x1xf32> to vector<8x32xf32>
    %108 = arith.mulf %103, %107 : vector<8x32xf32>
    %109 = vector.broadcast %89 : vector<1x32xf32> to vector<8x32xf32>
    %110 = arith.mulf %108, %109 : vector<8x32xf32>
    %111 = vector.broadcast %90 : vector<1x32xf32> to vector<8x32xf32>
    %112 = arith.addf %110, %111 : vector<8x32xf32>
    %c0_40 = arith.constant 0 : index
    %c0_41 = arith.constant 0 : index
    %113 = vector.load %arg9[%c0_40, %c0_41] : memref<32x64xf32, #tpu.memory_space<vmem>>, vector<32x64xf32>
    %cst_42 = arith.constant dense<0.000000e+00> : vector<8x64xf32>
    %114 = tpu.matmul %112, %113, %cst_42 {dimension_numbers = #tpu.dot_dimension_numbers<[1], [0], [0], [1], [0, 0, 1, 1], [], []>} : vector<8x32xf32>, vector<32x64xf32>, vector<8x64xf32> -> vector<8x64xf32>
    %c0_43 = arith.constant 0 : index
    %c0_44 = arith.constant 0 : index
    %115 = vector.load %arg10[%c0_43, %c0_44] : memref<1x64xf32, #tpu.memory_space<vmem>>, vector<1x64xf32>
    %116 = vector.broadcast %115 : vector<1x64xf32> to vector<8x64xf32>
    %117 = arith.addf %114, %116 : vector<8x64xf32>
    %cst_45 = arith.constant 0.000000e+00 : f32
    %118 = vector.broadcast %cst_45 : f32 to vector<8x64xf32>
    %119 = arith.maximumf %117, %118 : vector<8x64xf32>
    %c0_46 = arith.constant 0 : index
    %c0_47 = arith.constant 0 : index
    %120 = vector.load %arg11[%c0_46, %c0_47] : memref<64x32xf32, #tpu.memory_space<vmem>>, vector<64x32xf32>
    %cst_48 = arith.constant dense<0.000000e+00> : vector<8x32xf32>
    %121 = tpu.matmul %119, %120, %cst_48 {dimension_numbers = #tpu.dot_dimension_numbers<[1], [0], [0], [1], [0, 0, 1, 1], [], []>} : vector<8x64xf32>, vector<64x32xf32>, vector<8x32xf32> -> vector<8x32xf32>
    %c0_49 = arith.constant 0 : index
    %c0_50 = arith.constant 0 : index
    %122 = vector.load %arg12[%c0_49, %c0_50] : memref<1x32xf32, #tpu.memory_space<vmem>>, vector<1x32xf32>
    %123 = vector.broadcast %122 : vector<1x32xf32> to vector<8x32xf32>
    %124 = arith.addf %121, %123 : vector<8x32xf32>
    %125 = arith.addf %112, %124 : vector<8x32xf32>
    %c0_51 = arith.constant 0 : index
    %c0_52 = arith.constant 0 : index
    %126 = vector.load %arg13[%c0_51, %c0_52] : memref<1x32xf32, #tpu.memory_space<vmem>>, vector<1x32xf32>
    %c0_53 = arith.constant 0 : index
    %c0_54 = arith.constant 0 : index
    %127 = vector.load %arg14[%c0_53, %c0_54] : memref<1x32xf32, #tpu.memory_space<vmem>>, vector<1x32xf32>
    %cst_55 = arith.constant dense<0.000000e+00> : vector<8xf32>
    %128 = vector.multi_reduction <add>, %125, %cst_55 [1] : vector<8x32xf32> to vector<8xf32>
    %129 = vector.shape_cast %128 : vector<8xf32> to vector<8x1xf32>
    %cst_56 = arith.constant 3.200000e+01 : f32
    %130 = vector.broadcast %cst_56 : f32 to vector<8x1xf32>
    %131 = arith.divf %129, %130 : vector<8x1xf32>
    %132 = vector.broadcast %131 : vector<8x1xf32> to vector<8x32xf32>
    %133 = arith.subf %125, %132 : vector<8x32xf32>
    %134 = arith.mulf %133, %133 : vector<8x32xf32>
    %cst_57 = arith.constant dense<0.000000e+00> : vector<8xf32>
    %135 = vector.multi_reduction <add>, %134, %cst_57 [1] : vector<8x32xf32> to vector<8xf32>
    %136 = vector.shape_cast %135 : vector<8xf32> to vector<8x1xf32>
    %cst_58 = arith.constant 3.200000e+01 : f32
    %137 = vector.broadcast %cst_58 : f32 to vector<8x1xf32>
    %138 = arith.divf %136, %137 : vector<8x1xf32>
    %139 = vector.broadcast %131 : vector<8x1xf32> to vector<8x32xf32>
    %140 = arith.subf %125, %139 : vector<8x32xf32>
    %cst_59 = arith.constant 9.99999974E-6 : f32
    %141 = vector.broadcast %cst_59 : f32 to vector<8x1xf32>
    %142 = arith.addf %138, %141 : vector<8x1xf32>
    %143 = math.rsqrt %142 : vector<8x1xf32>
    %144 = vector.broadcast %143 : vector<8x1xf32> to vector<8x32xf32>
    %145 = arith.mulf %140, %144 : vector<8x32xf32>
    %146 = vector.broadcast %126 : vector<1x32xf32> to vector<8x32xf32>
    %147 = arith.mulf %145, %146 : vector<8x32xf32>
    %148 = vector.broadcast %127 : vector<1x32xf32> to vector<8x32xf32>
    %149 = arith.addf %147, %148 : vector<8x32xf32>
    %c0_60 = arith.constant 0 : index
    %c0_61 = arith.constant 0 : index
    %c0_62 = arith.constant 0 : index
    %150 = vector.load %arg15[%c0_60, %c0_61, %c0_62] : memref<1x8x32xf32, #tpu.memory_space<vmem>>, vector<1x8x32xf32>
    %151 = vector.shape_cast %150 : vector<1x8x32xf32> to vector<8x32xf32>
    %152 = vector.shape_cast %149 : vector<8x32xf32> to vector<1x8x32xf32>
    tpu.vector_store %arg15[%c0_60, %c0_61, %c0_62], %152 {strides = array<i32>} : memref<1x8x32xf32, #tpu.memory_space<vmem>>, vector<1x8x32xf32>,
    return
  }
  func.func @transform_0(%arg0: i32) -> (i32, i32, i32) {
    %c0_i32 = arith.constant 0 : i32
    %c0_i32_0 = arith.constant 0 : i32
    %c0_i32_1 = arith.constant 0 : i32
    return %arg0, %c0_i32, %c0_i32_0 : i32, i32, i32
  }
  func.func @transform_1(%arg0: i32) -> (i32, i32, i32) {
    %c0_i32 = arith.constant 0 : i32
    %c0_i32_0 = arith.constant 0 : i32
    %c0_i32_1 = arith.constant 0 : i32
    return %arg0, %c0_i32, %c0_i32_0 : i32, i32, i32
  }
  func.func @transform_2(%arg0: i32) -> (i32, i32) {
    %c0_i32 = arith.constant 0 : i32
    %c0_i32_0 = arith.constant 0 : i32
    %c0_i32_1 = arith.constant 0 : i32
    return %c0_i32, %c0_i32_0 : i32, i32
  }
  func.func @transform_3(%arg0: i32) -> (i32, i32) {
    %c0_i32 = arith.constant 0 : i32
    %c0_i32_0 = arith.constant 0 : i32
    %c0_i32_1 = arith.constant 0 : i32
    return %c0_i32, %c0_i32_0 : i32, i32
  }
  func.func @transform_4(%arg0: i32) -> (i32, i32) {
    %c0_i32 = arith.constant 0 : i32
    %c0_i32_0 = arith.constant 0 : i32
    %c0_i32_1 = arith.constant 0 : i32
    return %c0_i32, %c0_i32_0 : i32, i32
  }
  func.func @transform_5(%arg0: i32) -> (i32, i32) {
    %c0_i32 = arith.constant 0 : i32
    %c0_i32_0 = arith.constant 0 : i32
    %c0_i32_1 = arith.constant 0 : i32
    return %c0_i32, %c0_i32_0 : i32, i32
  }
  func.func @transform_6(%arg0: i32) -> (i32, i32) {
    %c0_i32 = arith.constant 0 : i32
    %c0_i32_0 = arith.constant 0 : i32
    %c0_i32_1 = arith.constant 0 : i32
    return %c0_i32, %c0_i32_0 : i32, i32
  }
  func.func @transform_7(%arg0: i32) -> (i32, i32) {
    %c0_i32 = arith.constant 0 : i32
    %c0_i32_0 = arith.constant 0 : i32
    %c0_i32_1 = arith.constant 0 : i32
    return %c0_i32, %c0_i32_0 : i32, i32
  }
  func.func @transform_8(%arg0: i32) -> (i32, i32) {
    %c0_i32 = arith.constant 0 : i32
    %c0_i32_0 = arith.constant 0 : i32
    %c0_i32_1 = arith.constant 0 : i32
    return %c0_i32, %c0_i32_0 : i32, i32
  }
  func.func @transform_9(%arg0: i32) -> (i32, i32) {
    %c0_i32 = arith.constant 0 : i32
    %c0_i32_0 = arith.constant 0 : i32
    %c0_i32_1 = arith.constant 0 : i32
    return %c0_i32, %c0_i32_0 : i32, i32
  }
  func.func @transform_10(%arg0: i32) -> (i32, i32) {
    %c0_i32 = arith.constant 0 : i32
    %c0_i32_0 = arith.constant 0 : i32
    %c0_i32_1 = arith.constant 0 : i32
    return %c0_i32, %c0_i32_0 : i32, i32
  }
  func.func @transform_11(%arg0: i32) -> (i32, i32) {
    %c0_i32 = arith.constant 0 : i32
    %c0_i32_0 = arith.constant 0 : i32
    %c0_i32_1 = arith.constant 0 : i32
    return %c0_i32, %c0_i32_0 : i32, i32
  }
  func.func @transform_12(%arg0: i32) -> (i32, i32) {
    %c0_i32 = arith.constant 0 : i32
    %c0_i32_0 = arith.constant 0 : i32
    %c0_i32_1 = arith.constant 0 : i32
    return %c0_i32, %c0_i32_0 : i32, i32
  }
  func.func @transform_13(%arg0: i32) -> (i32, i32) {
    %c0_i32 = arith.constant 0 : i32
    %c0_i32_0 = arith.constant 0 : i32
    %c0_i32_1 = arith.constant 0 : i32
    return %c0_i32, %c0_i32_0 : i32, i32
  }
  func.func @transform_14(%arg0: i32) -> (i32, i32, i32) {
    %c0_i32 = arith.constant 0 : i32
    %c0_i32_0 = arith.constant 0 : i32
    %c0_i32_1 = arith.constant 0 : i32
    return %arg0, %c0_i32, %c0_i32_0 : i32, i32, i32
  }
}

module attributes {stable_mosaic.version = 11 : i64} {
  func.func @_decoder_layer_kernel(%arg0: i32, %arg1: memref<1x1x32xf32, #tpu.memory_space<vmem>>, %arg2: memref<1x8x32xf32, #tpu.memory_space<vmem>>, %arg3: memref<1x1x8xf32, #tpu.memory_space<vmem>>, %arg4: memref<32x32xf32, #tpu.memory_space<vmem>>, %arg5: memref<1x32xf32, #tpu.memory_space<vmem>>, %arg6: memref<32x32xf32, #tpu.memory_space<vmem>>, %arg7: memref<1x32xf32, #tpu.memory_space<vmem>>, %arg8: memref<1x32xf32, #tpu.memory_space<vmem>>, %arg9: memref<1x32xf32, #tpu.memory_space<vmem>>, %arg10: memref<32x32xf32, #tpu.memory_space<vmem>>, %arg11: memref<1x32xf32, #tpu.memory_space<vmem>>, %arg12: memref<32x64xf32, #tpu.memory_space<vmem>>, %arg13: memref<1x64xf32, #tpu.memory_space<vmem>>, %arg14: memref<32x32xf32, #tpu.memory_space<vmem>>, %arg15: memref<1x32xf32, #tpu.memory_space<vmem>>, %arg16: memref<1x32xf32, #tpu.memory_space<vmem>>, %arg17: memref<1x32xf32, #tpu.memory_space<vmem>>, %arg18: memref<32x64xf32, #tpu.memory_space<vmem>>, %arg19: memref<1x64xf32, #tpu.memory_space<vmem>>, %arg20: memref<64x32xf32, #tpu.memory_space<vmem>>, %arg21: memref<1x32xf32, #tpu.memory_space<vmem>>, %arg22: memref<1x32xf32, #tpu.memory_space<vmem>>, %arg23: memref<1x32xf32, #tpu.memory_space<vmem>>, %arg24: memref<1x1x32xf32, #tpu.memory_space<vmem>>) attributes {dimension_semantics = [#tpu.dimension_semantics<parallel>], iteration_bounds = array<i64: 2>, scalar_prefetch = 0 : i64, scratch_operands = 0 : i64, tpu.core_type = #tpu.core_type<tc>, window_params = [{transform_indices = @transform_0, window_bounds = array<i64: 1, 1, 32>}, {transform_indices = @transform_1, window_bounds = array<i64: 1, 8, 32>}, {transform_indices = @transform_2, window_bounds = array<i64: 1, 1, 8>}, {pipeline_mode = #tpu.pipeline_mode<synchronous>, transform_indices = @transform_3, window_bounds = array<i64: 32, 32>}, {pipeline_mode = #tpu.pipeline_mode<synchronous>, transform_indices = @transform_4, window_bounds = array<i64: 1, 32>}, {pipeline_mode = #tpu.pipeline_mode<synchronous>, transform_indices = @transform_5, window_bounds = array<i64: 32, 32>}, {pipeline_mode = #tpu.pipeline_mode<synchronous>, transform_indices = @transform_6, window_bounds = array<i64: 1, 32>}, {pipeline_mode = #tpu.pipeline_mode<synchronous>, transform_indices = @transform_7, window_bounds = array<i64: 1, 32>}, {pipeline_mode = #tpu.pipeline_mode<synchronous>, transform_indices = @transform_8, window_bounds = array<i64: 1, 32>}, {pipeline_mode = #tpu.pipeline_mode<synchronous>, transform_indices = @transform_9, window_bounds = array<i64: 32, 32>}, {pipeline_mode = #tpu.pipeline_mode<synchronous>, transform_indices = @transform_10, window_bounds = array<i64: 1, 32>}, {pipeline_mode = #tpu.pipeline_mode<synchronous>, transform_indices = @transform_11, window_bounds = array<i64: 32, 64>}, {pipeline_mode = #tpu.pipeline_mode<synchronous>, transform_indices = @transform_12, window_bounds = array<i64: 1, 64>}, {pipeline_mode = #tpu.pipeline_mode<synchronous>, transform_indices = @transform_13, window_bounds = array<i64: 32, 32>}, {pipeline_mode = #tpu.pipeline_mode<synchronous>, transform_indices = @transform_14, window_bounds = array<i64: 1, 32>}, {pipeline_mode = #tpu.pipeline_mode<synchronous>, transform_indices = @transform_15, window_bounds = array<i64: 1, 32>}, {pipeline_mode = #tpu.pipeline_mode<synchronous>, transform_indices = @transform_16, window_bounds = array<i64: 1, 32>}, {pipeline_mode = #tpu.pipeline_mode<synchronous>, transform_indices = @transform_17, window_bounds = array<i64: 32, 64>}, {pipeline_mode = #tpu.pipeline_mode<synchronous>, transform_indices = @transform_18, window_bounds = array<i64: 1, 64>}, {pipeline_mode = #tpu.pipeline_mode<synchronous>, transform_indices = @transform_19, window_bounds = array<i64: 64, 32>}, {pipeline_mode = #tpu.pipeline_mode<synchronous>, transform_indices = @transform_20, window_bounds = array<i64: 1, 32>}, {pipeline_mode = #tpu.pipeline_mode<synchronous>, transform_indices = @transform_21, window_bounds = array<i64: 1, 32>}, {pipeline_mode = #tpu.pipeline_mode<synchronous>, transform_indices = @transform_22, window_bounds = array<i64: 1, 32>}, {transform_indices = @transform_23, window_bounds = array<i64: 1, 1, 32>}]} {
    %c0 = arith.constant 0 : index
    %c0_0 = arith.constant 0 : index
    %c0_1 = arith.constant 0 : index
    %0 = vector.load %arg1[%c0, %c0_0, %c0_1] : memref<1x1x32xf32, #tpu.memory_space<vmem>>, vector<1x1x32xf32>
    %1 = vector.shape_cast %0 : vector<1x1x32xf32> to vector<1x32xf32>
    %c0_2 = arith.constant 0 : index
    %c0_3 = arith.constant 0 : index
    %c0_4 = arith.constant 0 : index
    %2 = vector.load %arg2[%c0_2, %c0_3, %c0_4] : memref<1x8x32xf32, #tpu.memory_space<vmem>>, vector<1x8x32xf32>
    %3 = vector.shape_cast %2 : vector<1x8x32xf32> to vector<8x32xf32>
    %c0_5 = arith.constant 0 : index
    %c0_6 = arith.constant 0 : index
    %c0_7 = arith.constant 0 : index
    %4 = vector.load %arg3[%c0_5, %c0_6, %c0_7] : memref<1x1x8xf32, #tpu.memory_space<vmem>>, vector<1x1x8xf32>
    %5 = vector.shape_cast %4 : vector<1x1x8xf32> to vector<1x8xf32>
    %c0_8 = arith.constant 0 : index
    %c0_9 = arith.constant 0 : index
    %6 = vector.load %arg4[%c0_8, %c0_9] : memref<32x32xf32, #tpu.memory_space<vmem>>, vector<32x32xf32>
    %cst = arith.constant dense<0.000000e+00> : vector<1x32xf32>
    %7 = tpu.matmul %1, %6, %cst {dimension_numbers = #tpu.dot_dimension_numbers<[1], [0], [0], [1], [0, 0, 1, 1], [], []>} : vector<1x32xf32>, vector<32x32xf32>, vector<1x32xf32> -> vector<1x32xf32>
    %c0_10 = arith.constant 0 : index
    %c0_11 = arith.constant 0 : index
    %8 = vector.load %arg5[%c0_10, %c0_11] : memref<1x32xf32, #tpu.memory_space<vmem>>, vector<1x32xf32>
    %9 = arith.addf %7, %8 : vector<1x32xf32>
    %c0_12 = arith.constant 0 : index
    %c0_13 = arith.constant 0 : index
    %10 = vector.load %arg6[%c0_12, %c0_13] : memref<32x32xf32, #tpu.memory_space<vmem>>, vector<32x32xf32>
    %cst_14 = arith.constant dense<0.000000e+00> : vector<1x32xf32>
    %11 = tpu.matmul %9, %10, %cst_14 {dimension_numbers = #tpu.dot_dimension_numbers<[1], [0], [0], [1], [0, 0, 1, 1], [], []>} : vector<1x32xf32>, vector<32x32xf32>, vector<1x32xf32> -> vector<1x32xf32>
    %c0_15 = arith.constant 0 : index
    %c0_16 = arith.constant 0 : index
    %12 = vector.load %arg7[%c0_15, %c0_16] : memref<1x32xf32, #tpu.memory_space<vmem>>, vector<1x32xf32>
    %13 = arith.addf %11, %12 : vector<1x32xf32>
    %14 = arith.addf %1, %13 : vector<1x32xf32>
    %c0_17 = arith.constant 0 : index
    %c0_18 = arith.constant 0 : index
    %15 = vector.load %arg8[%c0_17, %c0_18] : memref<1x32xf32, #tpu.memory_space<vmem>>, vector<1x32xf32>
    %c0_19 = arith.constant 0 : index
    %c0_20 = arith.constant 0 : index
    %16 = vector.load %arg9[%c0_19, %c0_20] : memref<1x32xf32, #tpu.memory_space<vmem>>, vector<1x32xf32>
    %cst_21 = arith.constant dense<0.000000e+00> : vector<1xf32>
    %17 = vector.multi_reduction <add>, %14, %cst_21 [1] : vector<1x32xf32> to vector<1xf32>
    %18 = vector.shape_cast %17 : vector<1xf32> to vector<1x1xf32>
    %cst_22 = arith.constant 3.200000e+01 : f32
    %19 = vector.broadcast %cst_22 : f32 to vector<1x1xf32>
    %20 = arith.divf %18, %19 : vector<1x1xf32>
    %21 = vector.broadcast %20 : vector<1x1xf32> to vector<1x32xf32>
    %22 = arith.subf %14, %21 : vector<1x32xf32>
    %23 = arith.mulf %22, %22 : vector<1x32xf32>
    %cst_23 = arith.constant dense<0.000000e+00> : vector<1xf32>
    %24 = vector.multi_reduction <add>, %23, %cst_23 [1] : vector<1x32xf32> to vector<1xf32>
    %25 = vector.shape_cast %24 : vector<1xf32> to vector<1x1xf32>
    %cst_24 = arith.constant 3.200000e+01 : f32
    %26 = vector.broadcast %cst_24 : f32 to vector<1x1xf32>
    %27 = arith.divf %25, %26 : vector<1x1xf32>
    %28 = vector.broadcast %20 : vector<1x1xf32> to vector<1x32xf32>
    %29 = arith.subf %14, %28 : vector<1x32xf32>
    %cst_25 = arith.constant 9.99999974E-6 : f32
    %30 = vector.broadcast %cst_25 : f32 to vector<1x1xf32>
    %31 = arith.addf %27, %30 : vector<1x1xf32>
    %32 = math.rsqrt %31 : vector<1x1xf32>
    %33 = vector.broadcast %32 : vector<1x1xf32> to vector<1x32xf32>
    %34 = arith.mulf %29, %33 : vector<1x32xf32>
    %35 = arith.mulf %34, %15 : vector<1x32xf32>
    %36 = arith.addf %35, %16 : vector<1x32xf32>
    %c0_26 = arith.constant 0 : index
    %c0_27 = arith.constant 0 : index
    %37 = vector.load %arg10[%c0_26, %c0_27] : memref<32x32xf32, #tpu.memory_space<vmem>>, vector<32x32xf32>
    %cst_28 = arith.constant dense<0.000000e+00> : vector<1x32xf32>
    %38 = tpu.matmul %36, %37, %cst_28 {dimension_numbers = #tpu.dot_dimension_numbers<[1], [0], [0], [1], [0, 0, 1, 1], [], []>} : vector<1x32xf32>, vector<32x32xf32>, vector<1x32xf32> -> vector<1x32xf32>
    %c0_29 = arith.constant 0 : index
    %c0_30 = arith.constant 0 : index
    %39 = vector.load %arg11[%c0_29, %c0_30] : memref<1x32xf32, #tpu.memory_space<vmem>>, vector<1x32xf32>
    %40 = arith.addf %38, %39 : vector<1x32xf32>
    %cst_31 = arith.constant 0.353553385 : f32
    %41 = vector.broadcast %cst_31 : f32 to vector<1x32xf32>
    %42 = arith.mulf %40, %41 : vector<1x32xf32>
    %c0_32 = arith.constant 0 : index
    %c0_33 = arith.constant 0 : index
    %43 = vector.load %arg12[%c0_32, %c0_33] : memref<32x64xf32, #tpu.memory_space<vmem>>, vector<32x64xf32>
    %cst_34 = arith.constant dense<0.000000e+00> : vector<8x64xf32>
    %44 = tpu.matmul %3, %43, %cst_34 {dimension_numbers = #tpu.dot_dimension_numbers<[1], [0], [0], [1], [0, 0, 1, 1], [], []>} : vector<8x32xf32>, vector<32x64xf32>, vector<8x64xf32> -> vector<8x64xf32>
    %c0_35 = arith.constant 0 : index
    %c0_36 = arith.constant 0 : index
    %45 = vector.load %arg13[%c0_35, %c0_36] : memref<1x64xf32, #tpu.memory_space<vmem>>, vector<1x64xf32>
    %46 = vector.broadcast %45 : vector<1x64xf32> to vector<8x64xf32>
    %47 = arith.addf %44, %46 : vector<8x64xf32>
    %48 = vector.extract_strided_slice %47 {offsets = [0, 0], sizes = [8, 32], strides = [1, 1]} : vector<8x64xf32> to vector<8x32xf32>
    %49 = vector.extract_strided_slice %47 {offsets = [0, 32], sizes = [8, 32], strides = [1, 1]} : vector<8x64xf32> to vector<8x32xf32>
    %50 = vector.extract_strided_slice %42 {offsets = [0, 0], sizes = [1, 8], strides = [1, 1]} : vector<1x32xf32> to vector<1x8xf32>
    %51 = vector.extract_strided_slice %48 {offsets = [0, 0], sizes = [8, 8], strides = [1, 1]} : vector<8x32xf32> to vector<8x8xf32>
    %52 = vector.extract_strided_slice %49 {offsets = [0, 0], sizes = [8, 8], strides = [1, 1]} : vector<8x32xf32> to vector<8x8xf32>
    %cst_37 = arith.constant dense<0.000000e+00> : vector<1x8xf32>
    %53 = tpu.matmul %50, %51, %cst_37 {dimension_numbers = #tpu.dot_dimension_numbers<[1], [1], [0], [0], [0, 0, 1, 0], [], []>} : vector<1x8xf32>, vector<8x8xf32>, vector<1x8xf32> -> vector<1x8xf32>
    %54 = arith.addf %53, %5 : vector<1x8xf32>
    %cst_38 = arith.constant dense<0xFF800000> : vector<1xf32>
    %55 = vector.multi_reduction <maximumf>, %54, %cst_38 [1] : vector<1x8xf32> to vector<1xf32>
    %56 = vector.shape_cast %55 : vector<1xf32> to vector<1x1xf32>
    %57 = vector.broadcast %56 : vector<1x1xf32> to vector<1x8xf32>
    %58 = arith.subf %54, %57 : vector<1x8xf32>
    %59 = math.exp %58 : vector<1x8xf32>
    %cst_39 = arith.constant dense<0.000000e+00> : vector<1xf32>
    %60 = vector.multi_reduction <add>, %59, %cst_39 [1] : vector<1x8xf32> to vector<1xf32>
    %61 = vector.shape_cast %60 : vector<1xf32> to vector<1x1xf32>
    %62 = tpu.reciprocal %61 {approx = true} : vector<1x1xf32> -> vector<1x1xf32>
    %63 = vector.broadcast %62 : vector<1x1xf32> to vector<1x8xf32>
    %64 = arith.mulf %59, %63 : vector<1x8xf32>
    %cst_40 = arith.constant dense<0.000000e+00> : vector<1x8xf32>
    %65 = tpu.matmul %64, %52, %cst_40 {dimension_numbers = #tpu.dot_dimension_numbers<[1], [0], [0], [1], [0, 0, 1, 1], [], []>} : vector<1x8xf32>, vector<8x8xf32>, vector<1x8xf32> -> vector<1x8xf32>
    %66 = vector.extract_strided_slice %42 {offsets = [0, 8], sizes = [1, 8], strides = [1, 1]} : vector<1x32xf32> to vector<1x8xf32>
    %67 = vector.extract_strided_slice %48 {offsets = [0, 8], sizes = [8, 8], strides = [1, 1]} : vector<8x32xf32> to vector<8x8xf32>
    %68 = vector.extract_strided_slice %49 {offsets = [0, 8], sizes = [8, 8], strides = [1, 1]} : vector<8x32xf32> to vector<8x8xf32>
    %cst_41 = arith.constant dense<0.000000e+00> : vector<1x8xf32>
    %69 = tpu.matmul %66, %67, %cst_41 {dimension_numbers = #tpu.dot_dimension_numbers<[1], [1], [0], [0], [0, 0, 1, 0], [], []>} : vector<1x8xf32>, vector<8x8xf32>, vector<1x8xf32> -> vector<1x8xf32>
    %70 = arith.addf %69, %5 : vector<1x8xf32>
    %cst_42 = arith.constant dense<0xFF800000> : vector<1xf32>
    %71 = vector.multi_reduction <maximumf>, %70, %cst_42 [1] : vector<1x8xf32> to vector<1xf32>
    %72 = vector.shape_cast %71 : vector<1xf32> to vector<1x1xf32>
    %73 = vector.broadcast %72 : vector<1x1xf32> to vector<1x8xf32>
    %74 = arith.subf %70, %73 : vector<1x8xf32>
    %75 = math.exp %74 : vector<1x8xf32>
    %cst_43 = arith.constant dense<0.000000e+00> : vector<1xf32>
    %76 = vector.multi_reduction <add>, %75, %cst_43 [1] : vector<1x8xf32> to vector<1xf32>
    %77 = vector.shape_cast %76 : vector<1xf32> to vector<1x1xf32>
    %78 = tpu.reciprocal %77 {approx = true} : vector<1x1xf32> -> vector<1x1xf32>
    %79 = vector.broadcast %78 : vector<1x1xf32> to vector<1x8xf32>
    %80 = arith.mulf %75, %79 : vector<1x8xf32>
    %cst_44 = arith.constant dense<0.000000e+00> : vector<1x8xf32>
    %81 = tpu.matmul %80, %68, %cst_44 {dimension_numbers = #tpu.dot_dimension_numbers<[1], [0], [0], [1], [0, 0, 1, 1], [], []>} : vector<1x8xf32>, vector<8x8xf32>, vector<1x8xf32> -> vector<1x8xf32>
    %82 = vector.extract_strided_slice %42 {offsets = [0, 16], sizes = [1, 8], strides = [1, 1]} : vector<1x32xf32> to vector<1x8xf32>
    %83 = vector.extract_strided_slice %48 {offsets = [0, 16], sizes = [8, 8], strides = [1, 1]} : vector<8x32xf32> to vector<8x8xf32>
    %84 = vector.extract_strided_slice %49 {offsets = [0, 16], sizes = [8, 8], strides = [1, 1]} : vector<8x32xf32> to vector<8x8xf32>
    %cst_45 = arith.constant dense<0.000000e+00> : vector<1x8xf32>
    %85 = tpu.matmul %82, %83, %cst_45 {dimension_numbers = #tpu.dot_dimension_numbers<[1], [1], [0], [0], [0, 0, 1, 0], [], []>} : vector<1x8xf32>, vector<8x8xf32>, vector<1x8xf32> -> vector<1x8xf32>
    %86 = arith.addf %85, %5 : vector<1x8xf32>
    %cst_46 = arith.constant dense<0xFF800000> : vector<1xf32>
    %87 = vector.multi_reduction <maximumf>, %86, %cst_46 [1] : vector<1x8xf32> to vector<1xf32>
    %88 = vector.shape_cast %87 : vector<1xf32> to vector<1x1xf32>
    %89 = vector.broadcast %88 : vector<1x1xf32> to vector<1x8xf32>
    %90 = arith.subf %86, %89 : vector<1x8xf32>
    %91 = math.exp %90 : vector<1x8xf32>
    %cst_47 = arith.constant dense<0.000000e+00> : vector<1xf32>
    %92 = vector.multi_reduction <add>, %91, %cst_47 [1] : vector<1x8xf32> to vector<1xf32>
    %93 = vector.shape_cast %92 : vector<1xf32> to vector<1x1xf32>
    %94 = tpu.reciprocal %93 {approx = true} : vector<1x1xf32> -> vector<1x1xf32>
    %95 = vector.broadcast %94 : vector<1x1xf32> to vector<1x8xf32>
    %96 = arith.mulf %91, %95 : vector<1x8xf32>
    %cst_48 = arith.constant dense<0.000000e+00> : vector<1x8xf32>
    %97 = tpu.matmul %96, %84, %cst_48 {dimension_numbers = #tpu.dot_dimension_numbers<[1], [0], [0], [1], [0, 0, 1, 1], [], []>} : vector<1x8xf32>, vector<8x8xf32>, vector<1x8xf32> -> vector<1x8xf32>
    %98 = vector.extract_strided_slice %42 {offsets = [0, 24], sizes = [1, 8], strides = [1, 1]} : vector<1x32xf32> to vector<1x8xf32>
    %99 = vector.extract_strided_slice %48 {offsets = [0, 24], sizes = [8, 8], strides = [1, 1]} : vector<8x32xf32> to vector<8x8xf32>
    %100 = vector.extract_strided_slice %49 {offsets = [0, 24], sizes = [8, 8], strides = [1, 1]} : vector<8x32xf32> to vector<8x8xf32>
    %cst_49 = arith.constant dense<0.000000e+00> : vector<1x8xf32>
    %101 = tpu.matmul %98, %99, %cst_49 {dimension_numbers = #tpu.dot_dimension_numbers<[1], [1], [0], [0], [0, 0, 1, 0], [], []>} : vector<1x8xf32>, vector<8x8xf32>, vector<1x8xf32> -> vector<1x8xf32>
    %102 = arith.addf %101, %5 : vector<1x8xf32>
    %cst_50 = arith.constant dense<0xFF800000> : vector<1xf32>
    %103 = vector.multi_reduction <maximumf>, %102, %cst_50 [1] : vector<1x8xf32> to vector<1xf32>
    %104 = vector.shape_cast %103 : vector<1xf32> to vector<1x1xf32>
    %105 = vector.broadcast %104 : vector<1x1xf32> to vector<1x8xf32>
    %106 = arith.subf %102, %105 : vector<1x8xf32>
    %107 = math.exp %106 : vector<1x8xf32>
    %cst_51 = arith.constant dense<0.000000e+00> : vector<1xf32>
    %108 = vector.multi_reduction <add>, %107, %cst_51 [1] : vector<1x8xf32> to vector<1xf32>
    %109 = vector.shape_cast %108 : vector<1xf32> to vector<1x1xf32>
    %110 = tpu.reciprocal %109 {approx = true} : vector<1x1xf32> -> vector<1x1xf32>
    %111 = vector.broadcast %110 : vector<1x1xf32> to vector<1x8xf32>
    %112 = arith.mulf %107, %111 : vector<1x8xf32>
    %cst_52 = arith.constant dense<0.000000e+00> : vector<1x8xf32>
    %113 = tpu.matmul %112, %100, %cst_52 {dimension_numbers = #tpu.dot_dimension_numbers<[1], [0], [0], [1], [0, 0, 1, 1], [], []>} : vector<1x8xf32>, vector<8x8xf32>, vector<1x8xf32> -> vector<1x8xf32>
    %114 = tpu.concatenate %65, %81, %97, %113 in 1 : vector<1x8xf32>, vector<1x8xf32>, vector<1x8xf32>, vector<1x8xf32> -> vector<1x32xf32>
    %c0_53 = arith.constant 0 : index
    %c0_54 = arith.constant 0 : index
    %115 = vector.load %arg14[%c0_53, %c0_54] : memref<32x32xf32, #tpu.memory_space<vmem>>, vector<32x32xf32>
    %cst_55 = arith.constant dense<0.000000e+00> : vector<1x32xf32>
    %116 = tpu.matmul %114, %115, %cst_55 {dimension_numbers = #tpu.dot_dimension_numbers<[1], [0], [0], [1], [0, 0, 1, 1], [], []>} : vector<1x32xf32>, vector<32x32xf32>, vector<1x32xf32> -> vector<1x32xf32>
    %c0_56 = arith.constant 0 : index
    %c0_57 = arith.constant 0 : index
    %117 = vector.load %arg15[%c0_56, %c0_57] : memref<1x32xf32, #tpu.memory_space<vmem>>, vector<1x32xf32>
    %118 = arith.addf %116, %117 : vector<1x32xf32>
    %119 = arith.addf %36, %118 : vector<1x32xf32>
    %c0_58 = arith.constant 0 : index
    %c0_59 = arith.constant 0 : index
    %120 = vector.load %arg16[%c0_58, %c0_59] : memref<1x32xf32, #tpu.memory_space<vmem>>, vector<1x32xf32>
    %c0_60 = arith.constant 0 : index
    %c0_61 = arith.constant 0 : index
    %121 = vector.load %arg17[%c0_60, %c0_61] : memref<1x32xf32, #tpu.memory_space<vmem>>, vector<1x32xf32>
    %cst_62 = arith.constant dense<0.000000e+00> : vector<1xf32>
    %122 = vector.multi_reduction <add>, %119, %cst_62 [1] : vector<1x32xf32> to vector<1xf32>
    %123 = vector.shape_cast %122 : vector<1xf32> to vector<1x1xf32>
    %cst_63 = arith.constant 3.200000e+01 : f32
    %124 = vector.broadcast %cst_63 : f32 to vector<1x1xf32>
    %125 = arith.divf %123, %124 : vector<1x1xf32>
    %126 = vector.broadcast %125 : vector<1x1xf32> to vector<1x32xf32>
    %127 = arith.subf %119, %126 : vector<1x32xf32>
    %128 = arith.mulf %127, %127 : vector<1x32xf32>
    %cst_64 = arith.constant dense<0.000000e+00> : vector<1xf32>
    %129 = vector.multi_reduction <add>, %128, %cst_64 [1] : vector<1x32xf32> to vector<1xf32>
    %130 = vector.shape_cast %129 : vector<1xf32> to vector<1x1xf32>
    %cst_65 = arith.constant 3.200000e+01 : f32
    %131 = vector.broadcast %cst_65 : f32 to vector<1x1xf32>
    %132 = arith.divf %130, %131 : vector<1x1xf32>
    %133 = vector.broadcast %125 : vector<1x1xf32> to vector<1x32xf32>
    %134 = arith.subf %119, %133 : vector<1x32xf32>
    %cst_66 = arith.constant 9.99999974E-6 : f32
    %135 = vector.broadcast %cst_66 : f32 to vector<1x1xf32>
    %136 = arith.addf %132, %135 : vector<1x1xf32>
    %137 = math.rsqrt %136 : vector<1x1xf32>
    %138 = vector.broadcast %137 : vector<1x1xf32> to vector<1x32xf32>
    %139 = arith.mulf %134, %138 : vector<1x32xf32>
    %140 = arith.mulf %139, %120 : vector<1x32xf32>
    %141 = arith.addf %140, %121 : vector<1x32xf32>
    %c0_67 = arith.constant 0 : index
    %c0_68 = arith.constant 0 : index
    %142 = vector.load %arg18[%c0_67, %c0_68] : memref<32x64xf32, #tpu.memory_space<vmem>>, vector<32x64xf32>
    %cst_69 = arith.constant dense<0.000000e+00> : vector<1x64xf32>
    %143 = tpu.matmul %141, %142, %cst_69 {dimension_numbers = #tpu.dot_dimension_numbers<[1], [0], [0], [1], [0, 0, 1, 1], [], []>} : vector<1x32xf32>, vector<32x64xf32>, vector<1x64xf32> -> vector<1x64xf32>
    %c0_70 = arith.constant 0 : index
    %c0_71 = arith.constant 0 : index
    %144 = vector.load %arg19[%c0_70, %c0_71] : memref<1x64xf32, #tpu.memory_space<vmem>>, vector<1x64xf32>
    %145 = arith.addf %143, %144 : vector<1x64xf32>
    %cst_72 = arith.constant 0.000000e+00 : f32
    %146 = vector.broadcast %cst_72 : f32 to vector<1x64xf32>
    %147 = arith.maximumf %145, %146 : vector<1x64xf32>
    %c0_73 = arith.constant 0 : index
    %c0_74 = arith.constant 0 : index
    %148 = vector.load %arg20[%c0_73, %c0_74] : memref<64x32xf32, #tpu.memory_space<vmem>>, vector<64x32xf32>
    %cst_75 = arith.constant dense<0.000000e+00> : vector<1x32xf32>
    %149 = tpu.matmul %147, %148, %cst_75 {dimension_numbers = #tpu.dot_dimension_numbers<[1], [0], [0], [1], [0, 0, 1, 1], [], []>} : vector<1x64xf32>, vector<64x32xf32>, vector<1x32xf32> -> vector<1x32xf32>
    %c0_76 = arith.constant 0 : index
    %c0_77 = arith.constant 0 : index
    %150 = vector.load %arg21[%c0_76, %c0_77] : memref<1x32xf32, #tpu.memory_space<vmem>>, vector<1x32xf32>
    %151 = arith.addf %149, %150 : vector<1x32xf32>
    %152 = arith.addf %141, %151 : vector<1x32xf32>
    %c0_78 = arith.constant 0 : index
    %c0_79 = arith.constant 0 : index
    %153 = vector.load %arg22[%c0_78, %c0_79] : memref<1x32xf32, #tpu.memory_space<vmem>>, vector<1x32xf32>
    %c0_80 = arith.constant 0 : index
    %c0_81 = arith.constant 0 : index
    %154 = vector.load %arg23[%c0_80, %c0_81] : memref<1x32xf32, #tpu.memory_space<vmem>>, vector<1x32xf32>
    %cst_82 = arith.constant dense<0.000000e+00> : vector<1xf32>
    %155 = vector.multi_reduction <add>, %152, %cst_82 [1] : vector<1x32xf32> to vector<1xf32>
    %156 = vector.shape_cast %155 : vector<1xf32> to vector<1x1xf32>
    %cst_83 = arith.constant 3.200000e+01 : f32
    %157 = vector.broadcast %cst_83 : f32 to vector<1x1xf32>
    %158 = arith.divf %156, %157 : vector<1x1xf32>
    %159 = vector.broadcast %158 : vector<1x1xf32> to vector<1x32xf32>
    %160 = arith.subf %152, %159 : vector<1x32xf32>
    %161 = arith.mulf %160, %160 : vector<1x32xf32>
    %cst_84 = arith.constant dense<0.000000e+00> : vector<1xf32>
    %162 = vector.multi_reduction <add>, %161, %cst_84 [1] : vector<1x32xf32> to vector<1xf32>
    %163 = vector.shape_cast %162 : vector<1xf32> to vector<1x1xf32>
    %cst_85 = arith.constant 3.200000e+01 : f32
    %164 = vector.broadcast %cst_85 : f32 to vector<1x1xf32>
    %165 = arith.divf %163, %164 : vector<1x1xf32>
    %166 = vector.broadcast %158 : vector<1x1xf32> to vector<1x32xf32>
    %167 = arith.subf %152, %166 : vector<1x32xf32>
    %cst_86 = arith.constant 9.99999974E-6 : f32
    %168 = vector.broadcast %cst_86 : f32 to vector<1x1xf32>
    %169 = arith.addf %165, %168 : vector<1x1xf32>
    %170 = math.rsqrt %169 : vector<1x1xf32>
    %171 = vector.broadcast %170 : vector<1x1xf32> to vector<1x32xf32>
    %172 = arith.mulf %167, %171 : vector<1x32xf32>
    %173 = arith.mulf %172, %153 : vector<1x32xf32>
    %174 = arith.addf %173, %154 : vector<1x32xf32>
    %c0_87 = arith.constant 0 : index
    %c0_88 = arith.constant 0 : index
    %c0_89 = arith.constant 0 : index
    %175 = vector.load %arg24[%c0_87, %c0_88, %c0_89] : memref<1x1x32xf32, #tpu.memory_space<vmem>>, vector<1x1x32xf32>
    %176 = vector.shape_cast %175 : vector<1x1x32xf32> to vector<1x32xf32>
    %177 = vector.shape_cast %174 : vector<1x32xf32> to vector<1x1x32xf32>
    tpu.vector_store %arg24[%c0_87, %c0_88, %c0_89], %177 {strides = array<i32>} : memref<1x1x32xf32, #tpu.memory_space<vmem>>, vector<1x1x32xf32>,
    return
  }
  func.func @transform_0(%arg0: i32) -> (i32, i32, i32) {
    %c0_i32 = arith.constant 0 : i32
    %c0_i32_0 = arith.constant 0 : i32
    %c0_i32_1 = arith.constant 0 : i32
    return %arg0, %c0_i32, %c0_i32_0 : i32, i32, i32
  }
  func.func @transform_1(%arg0: i32) -> (i32, i32, i32) {
    %c0_i32 = arith.constant 0 : i32
    %c0_i32_0 = arith.constant 0 : i32
    %c0_i32_1 = arith.constant 0 : i32
    return %arg0, %c0_i32, %c0_i32_0 : i32, i32, i32
  }
  func.func @transform_2(%arg0: i32) -> (i32, i32, i32) {
    %c0_i32 = arith.constant 0 : i32
    %c0_i32_0 = arith.constant 0 : i32
    %c0_i32_1 = arith.constant 0 : i32
    return %arg0, %c0_i32, %c0_i32_0 : i32, i32, i32
  }
  func.func @transform_3(%arg0: i32) -> (i32, i32) {
    %c0_i32 = arith.constant 0 : i32
    %c0_i32_0 = arith.constant 0 : i32
    %c0_i32_1 = arith.constant 0 : i32
    return %c0_i32, %c0_i32_0 : i32, i32
  }
  func.func @transform_4(%arg0: i32) -> (i32, i32) {
    %c0_i32 = arith.constant 0 : i32
    %c0_i32_0 = arith.constant 0 : i32
    %c0_i32_1 = arith.constant 0 : i32
    return %c0_i32, %c0_i32_0 : i32, i32
  }
  func.func @transform_5(%arg0: i32) -> (i32, i32) {
    %c0_i32 = arith.constant 0 : i32
    %c0_i32_0 = arith.constant 0 : i32
    %c0_i32_1 = arith.constant 0 : i32
    return %c0_i32, %c0_i32_0 : i32, i32
  }
  func.func @transform_6(%arg0: i32) -> (i32, i32) {
    %c0_i32 = arith.constant 0 : i32
    %c0_i32_0 = arith.constant 0 : i32
    %c0_i32_1 = arith.constant 0 : i32
    return %c0_i32, %c0_i32_0 : i32, i32
  }
  func.func @transform_7(%arg0: i32) -> (i32, i32) {
    %c0_i32 = arith.constant 0 : i32
    %c0_i32_0 = arith.constant 0 : i32
    %c0_i32_1 = arith.constant 0 : i32
    return %c0_i32, %c0_i32_0 : i32, i32
  }
  func.func @transform_8(%arg0: i32) -> (i32, i32) {
    %c0_i32 = arith.constant 0 : i32
    %c0_i32_0 = arith.constant 0 : i32
    %c0_i32_1 = arith.constant 0 : i32
    return %c0_i32, %c0_i32_0 : i32, i32
  }
  func.func @transform_9(%arg0: i32) -> (i32, i32) {
    %c0_i32 = arith.constant 0 : i32
    %c0_i32_0 = arith.constant 0 : i32
    %c0_i32_1 = arith.constant 0 : i32
    return %c0_i32, %c0_i32_0 : i32, i32
  }
  func.func @transform_10(%arg0: i32) -> (i32, i32) {
    %c0_i32 = arith.constant 0 : i32
    %c0_i32_0 = arith.constant 0 : i32
    %c0_i32_1 = arith.constant 0 : i32
    return %c0_i32, %c0_i32_0 : i32, i32
  }
  func.func @transform_11(%arg0: i32) -> (i32, i32) {
    %c0_i32 = arith.constant 0 : i32
    %c0_i32_0 = arith.constant 0 : i32
    %c0_i32_1 = arith.constant 0 : i32
    return %c0_i32, %c0_i32_0 : i32, i32
  }
  func.func @transform_12(%arg0: i32) -> (i32, i32) {
    %c0_i32 = arith.constant 0 : i32
    %c0_i32_0 = arith.constant 0 : i32
    %c0_i32_1 = arith.constant 0 : i32
    return %c0_i32, %c0_i32_0 : i32, i32
  }
  func.func @transform_13(%arg0: i32) -> (i32, i32) {
    %c0_i32 = arith.constant 0 : i32
    %c0_i32_0 = arith.constant 0 : i32
    %c0_i32_1 = arith.constant 0 : i32
    return %c0_i32, %c0_i32_0 : i32, i32
  }
  func.func @transform_14(%arg0: i32) -> (i32, i32) {
    %c0_i32 = arith.constant 0 : i32
    %c0_i32_0 = arith.constant 0 : i32
    %c0_i32_1 = arith.constant 0 : i32
    return %c0_i32, %c0_i32_0 : i32, i32
  }
  func.func @transform_15(%arg0: i32) -> (i32, i32) {
    %c0_i32 = arith.constant 0 : i32
    %c0_i32_0 = arith.constant 0 : i32
    %c0_i32_1 = arith.constant 0 : i32
    return %c0_i32, %c0_i32_0 : i32, i32
  }
  func.func @transform_16(%arg0: i32) -> (i32, i32) {
    %c0_i32 = arith.constant 0 : i32
    %c0_i32_0 = arith.constant 0 : i32
    %c0_i32_1 = arith.constant 0 : i32
    return %c0_i32, %c0_i32_0 : i32, i32
  }
  func.func @transform_17(%arg0: i32) -> (i32, i32) {
    %c0_i32 = arith.constant 0 : i32
    %c0_i32_0 = arith.constant 0 : i32
    %c0_i32_1 = arith.constant 0 : i32
    return %c0_i32, %c0_i32_0 : i32, i32
  }
  func.func @transform_18(%arg0: i32) -> (i32, i32) {
    %c0_i32 = arith.constant 0 : i32
    %c0_i32_0 = arith.constant 0 : i32
    %c0_i32_1 = arith.constant 0 : i32
    return %c0_i32, %c0_i32_0 : i32, i32
  }
  func.func @transform_19(%arg0: i32) -> (i32, i32) {
    %c0_i32 = arith.constant 0 : i32
    %c0_i32_0 = arith.constant 0 : i32
    %c0_i32_1 = arith.constant 0 : i32
    return %c0_i32, %c0_i32_0 : i32, i32
  }
  func.func @transform_20(%arg0: i32) -> (i32, i32) {
    %c0_i32 = arith.constant 0 : i32
    %c0_i32_0 = arith.constant 0 : i32
    %c0_i32_1 = arith.constant 0 : i32
    return %c0_i32, %c0_i32_0 : i32, i32
  }
  func.func @transform_21(%arg0: i32) -> (i32, i32) {
    %c0_i32 = arith.constant 0 : i32
    %c0_i32_0 = arith.constant 0 : i32
    %c0_i32_1 = arith.constant 0 : i32
    return %c0_i32, %c0_i32_0 : i32, i32
  }
  func.func @transform_22(%arg0: i32) -> (i32, i32) {
    %c0_i32 = arith.constant 0 : i32
    %c0_i32_0 = arith.constant 0 : i32
    %c0_i32_1 = arith.constant 0 : i32
    return %c0_i32, %c0_i32_0 : i32, i32
  }
  func.func @transform_23(%arg0: i32) -> (i32, i32, i32) {
    %c0_i32 = arith.constant 0 : i32
    %c0_i32_0 = arith.constant 0 : i32
    %c0_i32_1 = arith.constant 0 : i32
    return %arg0, %c0_i32, %c0_i32_0 : i32, i32, i32
  }
}

module attributes {stable_mosaic.version = 11 : i64} {
  func.func @_dense_kernel(%arg0: i32, %arg1: memref<2x32xf32, #tpu.memory_space<vmem>>, %arg2: memref<32x10xf32, #tpu.memory_space<vmem>>, %arg3: memref<1x10xf32, #tpu.memory_space<vmem>>, %arg4: memref<2x10xf32, #tpu.memory_space<vmem>>) attributes {dimension_semantics = [#tpu.dimension_semantics<arbitrary>], iteration_bounds = array<i64: 1>, scalar_prefetch = 0 : i64, scratch_operands = 0 : i64, tpu.core_type = #tpu.core_type<tc>, window_params = [{pipeline_mode = #tpu.pipeline_mode<synchronous>, transform_indices = @transform_0, window_bounds = array<i64: 2, 32>}, {pipeline_mode = #tpu.pipeline_mode<synchronous>, transform_indices = @transform_1, window_bounds = array<i64: 32, 10>}, {pipeline_mode = #tpu.pipeline_mode<synchronous>, transform_indices = @transform_2, window_bounds = array<i64: 1, 10>}, {pipeline_mode = #tpu.pipeline_mode<synchronous>, transform_indices = @transform_3, window_bounds = array<i64: 2, 10>}]} {
    %c0 = arith.constant 0 : index
    %c0_0 = arith.constant 0 : index
    %0 = vector.load %arg1[%c0, %c0_0] : memref<2x32xf32, #tpu.memory_space<vmem>>, vector<2x32xf32>
    %c0_1 = arith.constant 0 : index
    %c0_2 = arith.constant 0 : index
    %1 = vector.load %arg2[%c0_1, %c0_2] : memref<32x10xf32, #tpu.memory_space<vmem>>, vector<32x10xf32>
    %cst = arith.constant dense<0.000000e+00> : vector<2x10xf32>
    %2 = tpu.matmul %0, %1, %cst {dimension_numbers = #tpu.dot_dimension_numbers<[1], [0], [0], [1], [0, 0, 1, 1], [], []>} : vector<2x32xf32>, vector<32x10xf32>, vector<2x10xf32> -> vector<2x10xf32>
    %c0_3 = arith.constant 0 : index
    %c0_4 = arith.constant 0 : index
    %3 = vector.load %arg3[%c0_3, %c0_4] : memref<1x10xf32, #tpu.memory_space<vmem>>, vector<1x10xf32>
    %4 = vector.broadcast %3 : vector<1x10xf32> to vector<2x10xf32>
    %5 = arith.addf %2, %4 : vector<2x10xf32>
    %c0_5 = arith.constant 0 : index
    %c0_6 = arith.constant 0 : index
    %6 = vector.load %arg4[%c0_5, %c0_6] : memref<2x10xf32, #tpu.memory_space<vmem>>, vector<2x10xf32>
    tpu.vector_store %arg4[%c0_5, %c0_6], %5 {strides = array<i32>} : memref<2x10xf32, #tpu.memory_space<vmem>>, vector<2x10xf32>,
    return
  }
  func.func @transform_0(%arg0: i32) -> (i32, i32) {
    %c0_i32 = arith.constant 0 : i32
    %c0_i32_0 = arith.constant 0 : i32
    %c0_i32_1 = arith.constant 0 : i32
    return %c0_i32, %c0_i32_0 : i32, i32
  }
  func.func @transform_1(%arg0: i32) -> (i32, i32) {
    %c0_i32 = arith.constant 0 : i32
    %c0_i32_0 = arith.constant 0 : i32
    %c0_i32_1 = arith.constant 0 : i32
    return %c0_i32, %c0_i32_0 : i32, i32
  }
  func.func @transform_2(%arg0: i32) -> (i32, i32) {
    %c0_i32 = arith.constant 0 : i32
    %c0_i32_0 = arith.constant 0 : i32
    %c0_i32_1 = arith.constant 0 : i32
    return %c0_i32, %c0_i32_0 : i32, i32
  }
  func.func @transform_3(%arg0: i32) -> (i32, i32) {
    %c0_i32 = arith.constant 0 : i32
    %c0_i32_0 = arith.constant 0 : i32
    %c0_i32_1 = arith.constant 0 : i32
    return %c0_i32, %c0_i32_0 : i32, i32
  }
}

</mosaic_0001>

<bundles_post_ra>
// kernel: transformer_oh_forward.4
= control target key start
LH: loop header
LB: loop body
LE: loop exit
PB: predicated region body
PF: predicated region fallthrough
CT: control target
= control target key end

     0   :  { %vm25_vm0 = vcmask 130048   ;;  %vm107_vm1 = vcmask 261120   ;;  %s173_s1 = inlined_call_operand.vmem [shape: f32[16,32], index: 1, kind: input, shape index: {}]   ;;  %s174_s0 = inlined_call_operand.vmem [shape: f32[16,16], index: 0, kind: input, shape index: {}]   ;;  %s175_s2 = inlined_call_operand.vmem [shape: f32[1,32], index: 2, kind: input, shape index: {}]   ;;  %s176_s3 = inlined_call_operand.vmem [shape: f32[16,32], index: 3, kind: output, shape index: {}]  }
   0x1   :  { %v16_v0 = vld [vmem:[%s173_s1] sm:$0xff]  ;;  %v17_v1 = vld [vmem:[%s173_s1 + $0x8] sm:$0xff] }
   0x2   :  { %v14_v2 = vld [vmem:[%s174_s0] sm:$0xff]  ;;  %v128_v3 = vpack.c.bf16 %v17_v1, %v16_v0  ;;  %v15_v4 = vld [vmem:[%s174_s0 + $0x8] sm:$0xff] }
   0x3   :  { %125 = vmatprep.mubr.msk.f32.mxu0 %vm25_vm0, %v14_v2  ;;  %v114_v5 = vld [vmem:[%s175_s2] ss:$0 sm:$0xff] }
   0x4   :  { %129 = vmatprep.subr.bf16.mxu0 %v128_v3 }
   0x5   :  { %131 = vmatpush3.bf16.msra.mxu0 %v128_v3 }
   0x8   :  { %126 = vmatmul.mubr.msk.f32.vlgmr.msra.gmra.mrb[0].mxu0 %vm25_vm0, %v15_v4 }
  0xdb   :  { %v127_v6 = vpop.f32.mrb[0].mxu0 }
  0xdc   :  { %v104_v7 = vadd.f32 %v127_v6, %v114_v5  ;;  %v98_v8 = vpop.f32.mrb[1].mxu0 }
  0xdd   :  { %v99_v9 = vadd.f32 %v114_v5, %v98_v8 }
  0xde   :  { %109 = vst.msk [vmem:[%s176_s3 + $0x8] sm:$0xff] %vm107_vm1, %v104_v7 }
  0xdf   :  { %108 = vst.msk [vmem:[%s176_s3] sm:$0xff] %vm107_vm1, %v99_v9 }

// kernel: transformer_oh_forward.7
= control target key start
LH: loop header
LB: loop body
LE: loop exit
PB: predicated region body
PF: predicated region fallthrough
CT: control target
= control target key end

     0   :  { %v169_v3 = vmov 0.0|0.0   ;;  %vm170_vm0 = vmmov 0   ;;  %v171_v6 = vmov 0.0   ;;  %s223_s0 = inlined_call_operand.vmem [shape: f32[2,32], index: 0, kind: input, shape index: {}]   ;;  %s224_s1 = inlined_call_operand.vmem [shape: f32[32,10], index: 1, kind: input, shape index: {}]   ;;  %s225_s2 = inlined_call_operand.vmem [shape: f32[1,10], index: 2, kind: input, shape index: {}]   ;;  %s226_s3 = inlined_call_operand.hbm [shape: f32[2,10], index: 3, kind: output, shape index: {}]  }
   0x1   :  { %v16_v0 = vld [vmem:[%s224_s1] sm:$0xff]  ;;  %v17_v1 = vld [vmem:[%s224_s1 + $0x8] sm:$0xff]  ;;  %v18_v2 = vld [vmem:[%s224_s1 + $0x10] sm:$0xff]  ;;  %135 = vmatprep.subr.bf16.mxu0 %v169_v3  ;;  %132 = vmatprep.mubr.msk.f32.mxu0 %vm170_vm0, %v171_v6 }
   0x2   :  { %v136_v4 = vpack.c.bf16 %v17_v1, %v16_v0  ;;  %v19_v5 = vld [vmem:[%s224_s1 + $0x18] sm:$0xff] }
   0x3   :  { %8 = vsyncpa [#allocation3], 0  ;;  %v139_v7 = vpack.c.bf16 %v19_v5, %v18_v2  ;;  %v15_v8 = vld [vmem:[%s223_s0] sm:$0x3]  ;;  %vm27_vm1 = vcmask 261120   ;;  %s172_s24 = smov [#allocation2]  }
   0x4   :  { %137 = vmatpush3.bf16.msra.mxu0 %v136_v4  ;;  %v117_v9 = vld [vmem:[%s225_s2] ss:$0 sm:$0xff]  ;;  %s109_s1 = sshll.u32 %s172_s24, 4  ;;  %vm101_vm2 = vcmask 74752   ;;  %s110_s1 = int_to_ptr.vmem [resolvable:$true] %s109_s1 }
   0x5   :  { %138 = vmatprep.subr.bf16.mxu0 %v169_v3  ;;  %s145_s25 = scalar_lea.vmem %s110_s1, 32  ;;  %p150_p1 = scmp.lt.s32.totalorder %s110_s1, %s110_s1 }
   0x6   :  { %p146_p0 = scmp.ne.s32.totalorder %s110_s1, %s145_s25  ;;  %p151_p2 = scmp.lt.s32.totalorder %s145_s25, %s145_s25 }
   0x8   :  { %140 = vmatpush3.bf16.msra.mxu0 %v139_v7  ;;  %p152_p3 = por %p151_p2, %p150_p1 }
   0xa   :  { %p153_p4 = pnand %p152_p3, %p146_p0 }
   0xb   :  { %133 = vmatmul.mubr.msk.f32.vlgmr.msra.gmra.mrb[0].mxu0 %vm27_vm1, %v15_v8 }
  0xde   :  { %v97_v10 = vpop.f32.mrb[0].mxu0 }
  0xdf   :  { %v98_v11 = vadd.f32 %v117_v9, %v97_v10  ;;  %v134_v12 = vpop.f32.mrb[1].mxu0 }
  0xe1   :  { %102 = vst.msk [vmem:[#allocation2] sm:$0x3] %vm101_vm2, %v98_v11 }
  0xe2   :  { %156 = shalt.err (!%p153_p4)
}
  0xe3   :  { %s157_s27 = scalar_lea.hbm %s226_s3, 32 }
  0xe4   :  { %p158_p5 = scmp.ne.s32.totalorder %s226_s3, %s157_s27  ;;  %p161_p6 = scmp.lt.u32.totalorder %s157_s27, %s226_s3 }
  0xe6   :  { %p163_p7 = pnand %p161_p6, %p158_p5 }
  0xe8   :  { %166 = shalt.err (!%p163_p7)
}
  0xe9   :  { %112 = dma.vmem_to_hbm [thread:$0]  %s110_s1, 32, %s226_s3, [#allocation3]  }
  0xea   :  { %167 = dma.done.wait [#allocation3], 32  }
  0xeb   :  { %168 = vsyncadd [#allocation3], 4294967264 }
  0xec   :  { %116 = vsyncpa [#allocation3], 1 }

// kernel: transformer_oh_forward.5
= control target key start
LH: loop header
LB: loop body
LE: loop exit
PB: predicated region body
PF: predicated region fallthrough
CT: control target
= control target key end

     0   :  { %s1972_s29 = smov 0   ;;  %s2170_s0 = inlined_call_operand.vmem [shape: f32[2,8,32], index: 0, kind: input, shape index: {}]   ;;  %s2171_s1 = inlined_call_operand.vmem [shape: f32[2,1,8], index: 1, kind: input, shape index: {}]   ;;  %s2172_s2 = inlined_call_operand.vmem [shape: f32[32,96], index: 2, kind: input, shape index: {}]   ;;  %s2173_s3 = inlined_call_operand.vmem [shape: f32[1,96], index: 3, kind: input, shape index: {}]   ;;  %s2174_s4 = inlined_call_operand.vmem [shape: f32[32,32], index: 4, kind: input, shape index: {}]   ;;  %s2175_s5 = inlined_call_operand.vmem [shape: f32[1,32], index: 5, kind: input, shape index: {}]   ;;  %s2176_s6 = inlined_call_operand.vmem [shape: f32[1,32], index: 6, kind: input, shape index: {}]   ;;  %s2177_s7 = inlined_call_operand.vmem [shape: f32[1,32], index: 7, kind: input, shape index: {}]   ;;  %s2178_s8 = inlined_call_operand.vmem [shape: f32[32,64], index: 8, kind: input, shape index: {}]   ;;  %s2179_s9 = inlined_call_operand.vmem [shape: f32[1,64], index: 9, kind: input, shape index: {}]   ;;  %s2180_s10 = inlined_call_operand.vmem [shape: f32[64,32], index: 10, kind: input, shape index: {}]   ;;  %s2181_s11 = inlined_call_operand.vmem [shape: f32[1,32], index: 11, kind: input, shape index: {}]   ;;  %s2182_s12 = inlined_call_operand.vmem [shape: f32[1,32], index: 12, kind: input, shape index: {}]   ;;  %s2183_s13 = inlined_call_operand.vmem [shape: f32[1,32], index: 13, kind: input, shape index: {}]   ;;  %s2184_s14 = inlined_call_operand.vmem [shape: f32[2,8,32], index: 14, kind: output, shape index: {}]  }
   0x1 LB: > { %s1631_s30 = sadd.s32 4294967295, %s1878_s29   ;;  %p1635_p0 = scmp.ge.s32.totalorder %s1878_s29, 1  ;;  %s1878_s29 = sphi %s1972_s29, %s24_s29  }
   0x2   : > { %p419_p1 = scmp.lt.s32.totalorder %s1878_s29, 3 }
   0x4   : > { %p420_p2 = pnand %p1635_p0, %p419_p1 }
   0x5   : > { %v479_v0 = vld [vmem:[%s2172_s2] sm:$0xff] (!%p420_p2)  ;;  %v480_v1 = vld [vmem:[%s2172_s2 + $0x8] sm:$0xff] (!%p420_p2)  ;;  %v481_v2 = vld [vmem:[%s2172_s2 + $0x10] sm:$0xff] (!%p420_p2)  ;;  %v1880_v3 = vmov (!%p420_p2), 0.0|0.0   ;;  %vm1881_vm0 = vmmov (!%p420_p2), 0   ;;  %v1882_v6 = vmov (!%p420_p2), 0.0  }
   0x6   : > { %423 = sbr.rel (%p420_p2) target bundleno = 2537 (0x9e9), region = 76  ;;  %1797 = vmatprep.subr.bf16.mxu1 (!%p420_p2), %v1880_v3  ;;  %v1798_v4 = vpack.c.bf16 (!%p420_p2), %v480_v1, %v479_v0  ;;  %v482_v5 = vld [vmem:[%s2172_s2 + $0x18] sm:$0xff] (!%p420_p2)  ;;  %1713 = vmatprep.mubr.msk.f32.mxu1 (!%p420_p2), %vm1881_vm0, %v1882_v6  ;;  %p466_p3 = scmp.lt.s32.totalorder (!%p420_p2), %s1631_s30, 1  ;;  %vm490_vm1 = vcmask (!%p420_p2), 261120   ;;  %v1638_v9 = vld [vmem:[%s2173_s3] ss:$0 sm:$0xff] (!%p420_p2) }
   0x7   : > { %1726 = vmatprep.subr.mxu0 (!%p420_p2), %v1882_v6  ;;  %1728 = vmatprep.mubr.msk.f32.mxu0 (!%p420_p2), %vm1881_vm0, %v1882_v6  ;;  %v1801_v7 = vpack.c.bf16 (!%p420_p2), %v482_v5, %v481_v2  ;;  %s1883_s15 = smov (!%p420_p2), 96   ;;  %s1884_s16 = smov (!%p420_p2), 120   ;;  %vm574_vm2 = vcmask (!%p420_p2), 64512   ;;  %vm1245_vm3 = vcmask (!%p420_p2), 130048   ;;  %vm1247_vm4 = vcmask (!%p420_p2), 195584  }
   0x8   : > { %1799 = vmatpush3.bf16.msra.mxu1 (!%p420_p2), %v1798_v4  ;;  %s1885_s17 = smov (!%p420_p2), 88   ;;  %s1886_s18 = smov (!%p420_p2), 80   ;;  %vm1464_vm5 = vcmask (!%p420_p2), 523264  }
   0x9   : > { %1800 = vmatprep.subr.bf16.mxu1 (!%p420_p2), %v1880_v3  ;;  %s1887_s19 = smov (!%p420_p2), 112   ;;  %s1888_s20 = smov (!%p420_p2), 72  }
   0xa   : > { %s1889_s21 = smov (!%p420_p2), 104   ;;  %s1891_s27 = smov (!%p420_p2), 64  }
   0xb   : > { %s1892_s28 = smov (!%p420_p2), 48  }
   0xc   : > { %1802 = vmatpush3.bf16.msra.mxu1 (!%p420_p2), %v1801_v7 }
   0xd   : > { %s2186_s30 = smov (!%p466_p3, %s1631_s30), 1  ;;  %1716 = vmatprep.subr.mxu1 %v1882_v6 }
   0xe   : > { %s1636_s23 = sshll.u32 %s2186_s30, 3  ;;  %s472_s25 = scalar_lea.vmem %s2171_s1, %s2186_s30 }
   0xf   : > { %s469_s26 = scalar_lea.vmem %s2170_s0, %s1636_s23  ;;  %v1640_v21 = vld [vmem:[%s472_s25] ss:$0 sm:$0xff] }
  0x10   : > { %v2007_v8 = vld [vmem:[%s469_s26] sm:$0xff]  ;;  %s1890_s26 = smov 56  }
  0x11   : > { %1714 = vmatmul.mubr.msk.f32.vlgmr.msra.gmra.mrb[0].mxu1 %vm490_vm1, %v2007_v8 }
  0x12   : > { %1718 = vmatprep.mubr.msk.f32.mxu1 %vm1881_vm0, %v1882_v6 }
  0xe4   : > { %v560_v10 = vpop.f32.mrb[0].mxu1 }
  0xe5   : > { %v2017_v11 = vadd.f32 %v1638_v9, %v560_v10  ;;  %v1715_v12 = vpop.f32.mrb[1].mxu1 }
  0xe7   : > { %572 = vrot.lane.b32.xlu0 %v2017_v11, %s1883_s15  ;;  %v564_v13 = vmul.f32 0.35355338, %v2017_v11  ;;  %s1893_s15 = smov 40  }
  0xe9   : > { %737 = vrot.lane.b32.xlu1 %v564_v13, %s1884_s16 }
  0xeb   : > { %739 = vrot.lane.b32.xlu0 %v2017_v11, %s1885_s17 }
  0xed   : > { %904 = vrot.lane.b32.xlu1 %v2017_v11, %s1886_s18 }
  0xef   : > { %902 = vrot.lane.b32.xlu0 %v564_v13, %s1887_s19 }
  0xf1   : > { %1069 = vrot.lane.b32.xlu1 %v2017_v11, %s1888_s20  ;;  %s1894_s20 = smov 8  }
  0xf3   : > { %1067 = vrot.lane.b32.xlu0 %v564_v13, %s1889_s21 }
 0x159   : > { %v573_v14 = vpop.permute.xlu0 %572 }
 0x15a   : > { %1717 = vmatpush3.xpose.msk.msra.mxu1 %vm574_vm2, %v573_v14  ;;  %v1250_v14 = vld [vmem:[%s2174_s4 + $0x8] sm:$0xff] }
 0x15b   : > { %v738_v15 = vpop.permute.xlu1 %737  ;;  %1721 = vmatprep.subr.mxu1 %v1882_v6 }
 0x15d   : > { %v740_v16 = vpop.permute.xlu0 %739  ;;  %1719 = vmatmul.mubr.msk.f32.vlgmr.msra.gmra.mrb[2].mxu1 %vm574_vm2, %v564_v13  ;;  %v1249_v13 = vld [vmem:[%s2174_s4] sm:$0xff] }
 0x15e   : > { %1727 = vmatpush3.xpose.msk.msra.mxu0 %vm574_vm2, %v740_v16  ;;  %1723 = vmatprep.mubr.msk.f32.mxu1 %vm1881_vm0, %v1882_v6 }
 0x15f   : > { %v905_v17 = vpop.permute.xlu1 %904  ;;  %1736 = vmatprep.subr.mxu0 %v1882_v6 }
 0x161   : > { %1729 = vmatmul.mubr.msk.f32.vlgmr.msra.gmra.mrb[0].mxu0 %vm574_vm2, %v738_v15  ;;  %v903_v18 = vpop.permute.xlu0 %902  ;;  %v1804_v15 = vpack.c.bf16 %v1250_v14, %v1249_v13 }
 0x162   : > { %1737 = vmatpush3.xpose.msk.msra.mxu0 %vm574_vm2, %v905_v17  ;;  %1738 = vmatprep.mubr.msk.f32.mxu0 %vm1881_vm0, %v1882_v6 }
 0x163   : > { %1746 = vmatprep.subr.mxu0 %v1882_v6  ;;  %v1070_v19 = vpop.permute.xlu1 %1069 }
 0x165   : > { %1739 = vmatmul.mubr.msk.f32.vlgmr.msra.gmra.mrb[2].mxu0 %vm574_vm2, %v903_v18  ;;  %v1068_v20 = vpop.permute.xlu0 %1067 }
 0x166   : > { %1747 = vmatpush3.xpose.msk.msra.mxu0 %vm574_vm2, %v1070_v19  ;;  %1748 = vmatprep.mubr.msk.f32.mxu0 %vm1881_vm0, %v1882_v6 }
 0x167   : > { %1803 = vmatprep.subr.bf16.mxu0 %v1880_v3 }
 0x169   : > { %1749 = vmatmul.mubr.msk.f32.vlgmr.msra.gmra.mrb[4].mxu0 %vm574_vm2, %v1068_v20  ;;  %v1251_v20 = vld [vmem:[%s2174_s4 + $0x10] sm:$0xff] }
 0x16a   : > { %1764 = vmatprep.mubr.msk.f32.mxu0 %vm1881_vm0, %v1882_v6  ;;  %1805 = vmatpush3.bf16.msra.mxu0 %v1804_v15 }
 0x16b   : > { %1806 = vmatprep.subr.bf16.mxu0 %v1880_v3 }
 0x230   : > { %v646_v22 = vpop.f32.mrb[2].mxu1 }
 0x231   : > { %v647_v23 = vadd.f32 %v1640_v21, %v646_v22  ;;  %v1720_v24 = vpop.f32.mrb[3].mxu1 }
 0x233   : > { %v650_v25 = vsel %vm574_vm2, %v647_v23, -inf }
 0x234   : > { %v811_v26 = vpop.f32.mrb[0].mxu0  ;;  %651 = vmax.xlane.f32.xlu1 %v650_v25 }
 0x235   : > { %v812_v27 = vadd.f32 %v1640_v21, %v811_v26  ;;  %v1730_v28 = vpop.f32.mrb[1].mxu0 }
 0x237   : > { %v815_v29 = vsel %vm574_vm2, %v812_v27, -inf }
 0x238   : > { %816 = vmax.xlane.f32.xlu0 %v815_v29  ;;  %v976_v30 = vpop.f32.mrb[2].mxu0 }
 0x239   : > { %v977_v31 = vadd.f32 %v1640_v21, %v976_v30  ;;  %v1740_v32 = vpop.f32.mrb[3].mxu0 }
 0x23b   : > { %v980_v33 = vsel %vm574_vm2, %v977_v31, -inf }
 0x23c   : > { %981 = vmax.xlane.f32.xlu0 %v980_v33  ;;  %v1141_v34 = vpop.f32.mrb[4].mxu0  ;;  %v1653_v33 = vld [vmem:[%s2175_s5] ss:$0 sm:$0xff] }
 0x23d   : > { %v1142_v35 = vadd.f32 %v1640_v21, %v1141_v34  ;;  %v1750_v36 = vpop.f32.mrb[5].mxu0  ;;  %v1252_v21 = vld [vmem:[%s2174_s4 + $0x18] sm:$0xff] }
 0x23e   : > { %v1807_v22 = vpack.c.bf16 %v1252_v21, %v1251_v20 }
 0x23f   : > { %v1145_v37 = vsel %vm574_vm2, %v1142_v35, -inf }
 0x240   : > { %1146 = vmax.xlane.f32.xlu1 %v1145_v37  ;;  %1808 = vmatpush3.bf16.msra.mxu0 %v1807_v22 }
 0x241   : > { %1815 = vmatprep.subr.bf16.mxu0 %v1880_v3 }
 0x251   : > { %826 = vrot.lane.b32.xlu1 %v2017_v11, %s1890_s26  ;;  %s1895_s26 = smov 16  }
 0x2c1   : > { %v652_v38 = vpop.xlane.xlu1 %651 }
 0x2c2   : > { %v653_v39 = vsub.f32 %v647_v23, %v652_v38 }
 0x2c4   : > { %v654_v40 = vmul.f32 1.442695, %v653_v39 }
 0x2c5   : > { %v817_v41 = vpop.xlane.xlu0 %816 }
 0x2c6   : > { %1852 = vpow2.f32 %v654_v40  ;;  %v818_v42 = vsub.f32 %v812_v27, %v817_v41 }
 0x2c8   : > { %v819_v43 = vmul.f32 1.442695, %v818_v42 }
 0x2c9   : > { %v982_v53 = vpop.xlane.xlu0 %981 }
 0x2ca   : > { %1854 = vpow2.f32 %v819_v43  ;;  %v983_v54 = vsub.f32 %v977_v31, %v982_v53 }
 0x2cc   : > { %v984_v55 = vmul.f32 1.442695, %v983_v54  ;;  %v1453_v54 = vld [vmem:[%s2180_s10 + $0x20] sm:$0xff] }
 0x2cd   : > { %v1147_v44 = vpop.xlane.xlu1 %1146 }
 0x2ce   : > { %v1148_v45 = vsub.f32 %v1142_v35, %v1147_v44  ;;  %v1365_v44 = vld [vmem:[%s2178_s8 + $0x8] sm:$0xff] }
 0x2d0   : > { %v1853_v46 = vpop.eup %1852  ;;  %v1149_v47 = vmul.f32 1.442695, %v1148_v45 }
 0x2d1   : > { %v656_v48 = vsel %vm574_vm2, %v1853_v46, 0.0  ;;  %v827_v58 = vpop.permute.xlu1 %826 }
 0x2d2   : > { %1856 = vpow2.f32 %v1149_v47  ;;  %657 = vadd.xlane.f32.xlu0 %v656_v48  ;;  %v1449_v48 = vld [vmem:[%s2180_s10] sm:$0xff] }
 0x2d3   : > { %1858 = vpow2.f32 %v984_v55  ;;  %v1454_v55 = vld [vmem:[%s2180_s10 + $0x28] sm:$0xff] }
 0x2d4   : > { %v1855_v49 = vpop.eup %1854 }
 0x2d5   : > { %v821_v50 = vsel %vm574_vm2, %v1855_v49, 0.0 }
 0x2d6   : > { %822 = vadd.xlane.f32.xlu1 %v821_v50  ;;  %v1451_v50 = vld [vmem:[%s2180_s10 + $0x10] sm:$0xff] }
 0x2dc   : > { %v1857_v51 = vpop.eup %1856 }
 0x2dd   : > { %v1151_v52 = vsel %vm574_vm2, %v1857_v51, 0.0  ;;  %v1859_v56 = vpop.eup %1858 }
 0x2de   : > { %1152 = vadd.xlane.f32.xlu1 %v1151_v52  ;;  %v986_v57 = vsel %vm574_vm2, %v1859_v56, 0.0  ;;  %v1452_v52 = vld [vmem:[%s2180_s10 + $0x18] sm:$0xff] }
 0x2df   : > { %v1819_v53 = vpack.c.bf16 %v1452_v52, %v1451_v50 }
 0x2e8   : > { %661 = vrot.lane.b32.xlu0 %v2017_v11, %s1891_s27  ;;  %s1896_s27 = smov 24  }
 0x2ef   : > { %991 = vrot.lane.b32.xlu1 %v2017_v11, %s1892_s28 }
 0x307   : > { %987 = vadd.xlane.f32.xlu0 %v986_v57 }
 0x31d   : > { %1156 = vrot.lane.b32.xlu0 %v2017_v11, %s1893_s15  ;;  %s476_s15 = scalar_lea.vmem %s2184_s14, %s1636_s23 }
 0x35f   : > { %v658_v59 = vpop.xlane.xlu0 %657 }
 0x360   : > { %1860 = vrcp.f32 %v658_v59 }
 0x363   : > { %v662_v60 = vpop.permute.xlu0 %661  ;;  %v823_v61 = vpop.xlane.xlu1 %822 }
 0x364   : > { %1862 = vrcp.f32 %v823_v61  ;;  %1722 = vmatpush3.msra.mxu1 %v662_v60  ;;  %v1655_v61 = vld [vmem:[%s2176_s6] ss:$0 sm:$0xff] }
 0x365   : > { %1731 = vmatprep.subr.mxu1 %v1882_v6 }
 0x36a   : > { %v1861_v62 = vpop.eup %1860 }
 0x36b   : > { %v660_v63 = vmul.f32 %v1861_v62, %v1853_v46  ;;  %v1153_v0 = vpop.xlane.xlu1 %1152  ;;  %v1367_v46 = vld [vmem:[%s2178_s8 + $0x18] sm:$0xff] }
 0x36d   : > { %1724 = vmatmul.mubr.msk.f32.vlgmr.msra.gmra.mrb[4].mxu1 %vm574_vm2, %v660_v63  ;;  %v1656_v63 = vld [vmem:[%s2177_s7] ss:$0 sm:$0xff] }
 0x36e   : > { %v1863_v1 = vpop.eup %1862  ;;  %1732 = vmatpush3.msra.mxu1 %v827_v58  ;;  %1733 = vmatprep.mubr.msk.f32.mxu1 %vm1881_vm0, %v1882_v6 }
 0x36f   : > { %v825_v2 = vmul.f32 %v1863_v1, %v1855_v49  ;;  %v992_v4 = vpop.permute.xlu1 %991  ;;  %1741 = vmatprep.subr.mxu1 %v1882_v6  ;;  %v1450_v49 = vld [vmem:[%s2180_s10 + $0x8] sm:$0xff] }
 0x371   : > { %1734 = vmatmul.mubr.msk.f32.vlgmr.msra.gmra.mrb[6].mxu1 %vm574_vm2, %v825_v2  ;;  %v1456_v2 = vld [vmem:[%s2180_s10 + $0x38] sm:$0xff] }
 0x372   : > { %1742 = vmatpush3.msra.mxu1 %v992_v4  ;;  %1743 = vmatprep.mubr.msk.f32.mxu1 %vm1881_vm0, %v1882_v6 }
 0x373   : > { %1751 = vmatprep.subr.mxu1 %v1882_v6 }
 0x394   : > { %v988_v5 = vpop.xlane.xlu0 %987 }
 0x395   : > { %1864 = vrcp.f32 %v988_v5  ;;  %v1657_v5 = vld [vmem:[%s2179_s9] ss:$0 sm:$0xff] }
 0x396   : > { %1866 = vrcp.f32 %v1153_v0 }
 0x398   : > { %v1157_v11 = vpop.permute.xlu0 %1156 }
 0x39f   : > { %v1865_v7 = vpop.eup %1864 }
 0x3a0   : > { %v990_v9 = vmul.f32 %v1865_v7, %v1859_v56  ;;  %v1867_v10 = vpop.eup %1866  ;;  %v1822_v56 = vpack.c.bf16 %v1454_v55, %v1453_v54 }
 0x3a1   : > { %v1155_v12 = vmul.f32 %v1867_v10, %v1857_v51  ;;  %v1816_v51 = vpack.c.bf16 %v1450_v49, %v1449_v48 }
 0x3a2   : > { %1744 = vmatmul.mubr.msk.f32.vlgmr.msra.gmra.mrb[8].mxu1 %vm574_vm2, %v990_v9 }
 0x3a3   : > { %1752 = vmatpush3.msra.mxu1 %v1157_v11  ;;  %1753 = vmatprep.mubr.msk.f32.mxu1 %vm1881_vm0, %v1882_v6 }
 0x3a4   : > { %1809 = vmatprep.subr.bf16.mxu1 %v1880_v3 }
 0x3a6   : > { %1754 = vmatmul.mubr.msk.f32.vlgmr.msra.gmra.mrb[10].mxu1 %vm574_vm2, %v1155_v12  ;;  %v1659_v12 = vld [vmem:[%s2181_s11] ss:$0 sm:$0xff] }
 0x3a7   : > { %1775 = vmatprep.mubr.msk.f32.mxu1 %vm1881_vm0, %v1882_v6 }
 0x440   : > { %v733_v16 = vpop.f32.mrb[4].mxu1 }
 0x441   : > { %v1725_v17 = vpop.f32.mrb[5].mxu1 }
 0x444   : > { %v898_v18 = vpop.f32.mrb[6].mxu1 }
 0x445   : > { %1233 = vrot.lane.b32.xlu1 %v898_v18, %s1894_s20  ;;  %v1735_v19 = vpop.f32.mrb[7].mxu1 }
 0x475   : > { %v1063_v23 = vpop.f32.mrb[8].mxu1 }
 0x476   : > { %1237 = vrot.lane.b32.xlu0 %v1063_v23, %s1895_s26  ;;  %v1745_v24 = vpop.f32.mrb[9].mxu1 }
 0x479   : > { %v1228_v25 = vpop.f32.mrb[10].mxu1 }
 0x47a   : > { %1241 = vrot.lane.b32.xlu1 %v1228_v25, %s1896_s27  ;;  %v1755_v26 = vpop.f32.mrb[11].mxu1 }
 0x4b7   : > { %v1234_v27 = vpop.permute.xlu1 %1233 }
 0x4b8   : > { %v1244_v29 = vsel %vm574_vm2, %v733_v16, %v1234_v27  ;;  %v1661_v27 = vld [vmem:[%s2182_s12] ss:$0 sm:$0xff] }
 0x4e8   : > { %v1238_v28 = vpop.permute.xlu0 %1237 }
 0x4e9   : > { %v1246_v30 = vsel %vm1245_vm3, %v1244_v29, %v1238_v28  ;;  %v1662_v29 = vld [vmem:[%s2183_s13] ss:$0 sm:$0xff] }
 0x4ec   : > { %v1242_v31 = vpop.permute.xlu1 %1241 }
 0x4ed   : > { %v1248_v32 = vsel %vm1247_vm4, %v1246_v30, %v1242_v31 }
 0x4ee   : > { %1765 = vmatmul.mubr.msk.f32.vlgmr.msra.gmra.mrb[6].mxu0 %vm490_vm1, %v1248_v32 }
 0x4ef   : > { %1794 = vmatprep.mubr.msk.f32.mxu0 %vm1881_vm0, %v1882_v6  ;;  %v1364_v6 = vld [vmem:[%s2178_s8] sm:$0xff]  ;;  %1817 = vmatpush3.bf16.msra.mxu0 %v1816_v51 }
 0x4f0   : > { %v1810_v45 = vpack.c.bf16 %v1365_v44, %v1364_v6  ;;  %1818 = vmatprep.subr.bf16.mxu0 %v1880_v3 }
 0x4f2   : > { %1811 = vmatpush3.bf16.msra.mxu1 %v1810_v45 }
 0x4f3   : > { %1812 = vmatprep.subr.bf16.mxu1 %v1880_v3  ;;  %1820 = vmatpush3.bf16.msra.mxu0 %v1819_v53 }
 0x4f4   : > { %1821 = vmatprep.subr.bf16.mxu0 %v1880_v3 }
 0x4f7   : > { %1823 = vmatpush3.bf16.msra.mxu0 %v1822_v56 }
 0x4f8   : > { %1824 = vmatprep.subr.bf16.mxu0 %v1880_v3  ;;  %v1455_v3 = vld [vmem:[%s2180_s10 + $0x30] sm:$0xff] }
 0x4f9   : > { %v1825_v4 = vpack.c.bf16 %v1456_v2, %v1455_v3 }
 0x4fb   : > { %1826 = vmatpush3.bf16.msra.mxu0 %v1825_v4 }
 0x5c1   : > { %v1329_v34 = vpop.f32.mrb[6].mxu0 }
 0x5c2   : > { %v1330_v35 = vadd.f32 %v1653_v33, %v1329_v34  ;;  %v1766_v36 = vpop.f32.mrb[7].mxu0 }
 0x5c4   : > { %v1333_v37 = vadd.f32 %v1330_v35, %v2007_v8  ;;  %v1366_v8 = vld [vmem:[%s2178_s8 + $0x10] sm:$0xff] }
 0x5c5   : > { %v1813_v47 = vpack.c.bf16 %v1367_v46, %v1366_v8 }
 0x5c6   : > { %v1336_v38 = vsel %vm490_vm1, %v1333_v37, 0.0 }
 0x5c7   : > { %1337 = vadd.xlane.f32.xlu0 %v1336_v38  ;;  %1814 = vmatpush3.bf16.msra.mxu1 %v1813_v47 }
 0x654   : > { %v1338_v39 = vpop.xlane.xlu0 %1337 }
 0x655   : > { %v1340_v40 = vmul.f32 0.03125, %v1338_v39 }
 0x657   : > { %v1341_v41 = vsub.f32 %v1333_v37, %v1340_v40 }
 0x659   : > { %v1342_v42 = vmul.f32 %v1341_v41, %v1341_v41 }
 0x65b   : > { %v1343_v43 = vsel %vm490_vm1, %v1342_v42, 0.0 }
 0x65c   : > { %1344 = vadd.xlane.f32.xlu1 %v1343_v43 }
 0x6e9   : > { %v1345_v57 = vpop.xlane.xlu1 %1344 }
 0x6ea   : > { %v1346_v58 = vmul.f32 0.03125, %v1345_v57 }
 0x6ec   : > { %v1347_v59 = vadd.f32 1e-05, %v1346_v58 }
 0x6ee   : > { %1868 = vrsqrt.f32 %v1347_v59 }
 0x6f8   : > { %v1869_v60 = vpop.eup %1868 }
 0x6f9   : > { %v1349_v62 = vmul.f32 %v1869_v60, %v1341_v41 }
 0x6fb   : > { %v1356_v0 = vmul.f32 %v1655_v61, %v1349_v62 }
 0x6fd   : > { %v1363_v1 = vadd.f32 %v1656_v63, %v1356_v0 }
 0x6ff   : > { %1776 = vmatmul.mubr.msk.f32.vlgmr.msra.gmra.mrb[12].mxu1 %vm490_vm1, %v1363_v1 }
 0x7d2   : > { %v1444_v7 = vpop.f32.mrb[12].mxu1 }
 0x7d3   : > { %v1445_v9 = vadd.f32 %v1657_v5, %v1444_v7  ;;  %v1777_v10 = vpop.f32.mrb[13].mxu1 }
 0x7d5   : > { %v1448_v11 = vmax.f32 %v1445_v9, 0.0 }
 0x7d7   : > { %1795 = vmatmul.mubr.msk.f32.vlgmr.msra.gmra.mrb[8].mxu0 %vm1464_vm5, %v1448_v11 }
 0x8aa   : > { %v1534_v13 = vpop.f32.mrb[8].mxu0 }
 0x8ab   : > { %v1535_v14 = vadd.f32 %v1659_v12, %v1534_v13  ;;  %v1796_v15 = vpop.f32.mrb[9].mxu0 }
 0x8ad   : > { %v1538_v16 = vadd.f32 %v1535_v14, %v1363_v1 }
 0x8af   : > { %v1541_v17 = vsel %vm490_vm1, %v1538_v16, 0.0 }
 0x8b0   : > { %1542 = vadd.xlane.f32.xlu0 %v1541_v17 }
 0x93d   : > { %v1543_v18 = vpop.xlane.xlu0 %1542 }
 0x93e   : > { %v1544_v19 = vmul.f32 0.03125, %v1543_v18 }
 0x940   : > { %v1545_v20 = vsub.f32 %v1538_v16, %v1544_v19 }
 0x942   : > { %v1546_v21 = vmul.f32 %v1545_v20, %v1545_v20 }
 0x944   : > { %v1547_v22 = vsel %vm490_vm1, %v1546_v21, 0.0 }
 0x945   : > { %1548 = vadd.xlane.f32.xlu0 %v1547_v22 }
 0x9d2   : > { %v1549_v23 = vpop.xlane.xlu0 %1548 }
 0x9d3   : > { %v1550_v24 = vmul.f32 0.03125, %v1549_v23 }
 0x9d5   : > { %v1551_v25 = vadd.f32 1e-05, %v1550_v24 }
 0x9d7   : > { %1870 = vrsqrt.f32 %v1551_v25 }
 0x9e1   : > { %v1871_v26 = vpop.eup %1870 }
 0x9e2   : > { %v1553_v28 = vmul.f32 %v1871_v26, %v1545_v20 }
 0x9e4   : > { %v1560_v30 = vmul.f32 %v1661_v27, %v1553_v28 }
 0x9e6   : > { %v1567_v31 = vadd.f32 %v1662_v29, %v1560_v30 }
 0x9e8   : > { %1568 = vst.msk [vmem:[%s476_s15] sm:$0xff] %vm490_vm1, %v1567_v31 }
 0x9e9 PF: > { %s24_s29 = sadd.s32 1, %s1878_s29  }
 0x9ea   : > { %p21_p4 = scmp.ge.s32.totalorder %s24_s29, 4  }
 0x9ec   :  { %23 = sbr.rel (!%p21_p4) target bundleno = 1 (0x1), region = 109 }

// kernel: transformer_oh_forward.6
= control target key start
LH: loop header
LB: loop body
LE: loop exit
PB: predicated region body
PF: predicated region fallthrough
CT: control target
= control target key end

     0   :  { %s2800_s0 = inlined_call_operand.vmem [shape: f32[2,1,32], index: 0, kind: input, shape index: {}]   ;;  %s2801_s1 = inlined_call_operand.vmem [shape: f32[2,8,32], index: 1, kind: input, shape index: {}]   ;;  %s2802_s2 = inlined_call_operand.vmem [shape: f32[2,1,8], index: 2, kind: input, shape index: {}]   ;;  %s2803_s3 = inlined_call_operand.vmem [shape: f32[32,32], index: 3, kind: input, shape index: {}]   ;;  %s2804_s4 = inlined_call_operand.vmem [shape: f32[1,32], index: 4, kind: input, shape index: {}]   ;;  %s2805_s5 = inlined_call_operand.vmem [shape: f32[32,32], index: 5, kind: input, shape index: {}]   ;;  %s2806_s6 = inlined_call_operand.vmem [shape: f32[1,32], index: 6, kind: input, shape index: {}]   ;;  %s2807_s7 = inlined_call_operand.vmem [shape: f32[1,32], index: 7, kind: input, shape index: {}]   ;;  %s2808_s8 = inlined_call_operand.vmem [shape: f32[1,32], index: 8, kind: input, shape index: {}]   ;;  %s2809_s9 = inlined_call_operand.vmem [shape: f32[32,32], index: 9, kind: input, shape index: {}]   ;;  %s2810_s10 = inlined_call_operand.vmem [shape: f32[1,32], index: 10, kind: input, shape index: {}]   ;;  %s2811_s11 = inlined_call_operand.vmem [shape: f32[32,64], index: 11, kind: input, shape index: {}]   ;;  %s2812_s12 = inlined_call_operand.vmem [shape: f32[1,64], index: 12, kind: input, shape index: {}]   ;;  %s2813_s13 = inlined_call_operand.vmem [shape: f32[32,32], index: 13, kind: input, shape index: {}]   ;;  %s2814_s14 = inlined_call_operand.vmem [shape: f32[1,32], index: 14, kind: input, shape index: {}]   ;;  %s2815_s15 = inlined_call_operand.vmem [shape: f32[1,32], index: 15, kind: input, shape index: {}]   ;;  %s2816_s16 = inlined_call_operand.vmem [shape: f32[1,32], index: 16, kind: input, shape index: {}]   ;;  %s2817_s17 = inlined_call_operand.vmem [shape: f32[32,64], index: 17, kind: input, shape index: {}]   ;;  %s2818_s18 = inlined_call_operand.vmem [shape: f32[1,64], index: 18, kind: input, shape index: {}]   ;;  %s2819_s19 = inlined_call_operand.vmem [shape: f32[64,32], index: 19, kind: input, shape index: {}]   ;;  %s2820_s20 = inlined_call_operand.vmem [shape: f32[1,32], index: 20, kind: input, shape index: {}]   ;;  %s2821_s21 = inlined_call_operand.vmem [shape: f32[1,32], index: 21, kind: input, shape index: {}]   ;;  %s2822_s22 = inlined_call_operand.vmem [shape: f32[1,32], index: 22, kind: input, shape index: {}]   ;;  %s2823_s23 = inlined_call_operand.vmem [shape: f32[2,1,32], index: 23, kind: output, shape index: {}]  }
   0x1   :  { %2828 = sst [smem:[#allocation2_spill]] %s2800_s0 }
   0x2   :  { %2829 = sst [smem:[#allocation3_spill]] %s2801_s1 }
   0x3   :  { %2830 = sst [smem:[#allocation4_spill]] %s2802_s2 }
   0x4   :  { %2831 = sst [smem:[#allocation5_spill]] %s2803_s3 }
   0x5   :  { %2832 = sst [smem:[#allocation6_spill]] %s2804_s4  ;;  %s2534_s4 = smov 0  }
   0x6   :  { %2833 = sst [smem:[#allocation7_spill]] %s2805_s5 }
   0x7   :  { %2834 = sst [smem:[#allocation8_spill]] %s2806_s6 }
   0x8   :  { %2835 = sst [smem:[#allocation9_spill]] %s2807_s7 }
   0x9 LB: > { %s2094_s30 = sadd.s32 4294967295, %s2399_s4   ;;  %p2098_p0 = scmp.ge.s32.totalorder %s2399_s4, 1  ;;  %s2399_s4 = sphi %s2534_s4, %s33_s4  }
   0xa   : > { %p652_p1 = scmp.lt.s32.totalorder %s2399_s4, 3 }
   0xc   : > { %p653_p2 = pnand %p2098_p0, %p652_p1 }
   0xd   : > { %s2836_s5 = sld [smem:[#allocation5_spill]] (!%p653_p2)  ;;  %v2401_v3 = vmov (!%p653_p2), 0.0|0.0   ;;  %vm2402_vm0 = vmmov (!%p653_p2), 0   ;;  %v2403_v6 = vmov (!%p653_p2), 0.0   ;;  %p719_p3 = scmp.lt.s32.totalorder (!%p653_p2), %s2094_s30, 1  ;;  %vm740_vm1 = vcmask (!%p653_p2), 261120  }
   0xe   : > { %656 = sbr.rel (%p653_p2) target bundleno = 3242 (0xcaa), region = 112  ;;  %2302 = vmatprep.subr.bf16.mxu1 (!%p653_p2), %v2401_v3  ;;  %2185 = vmatprep.mubr.msk.f32.mxu1 (!%p653_p2), %vm2402_vm0, %v2403_v6  ;;  %s2837_s3 = sld [smem:[#allocation7_spill]] (!%p653_p2)  ;;  %vm895_vm2 = vcmask (!%p653_p2), 253952   ;;  %v991_v30 = vld [vmem:[%s2811_s11] sm:$0xff] (!%p653_p2)  ;;  %v992_v31 = vld [vmem:[%s2811_s11 + $0x8] sm:$0xff] (!%p653_p2)  ;;  %v993_v33 = vld [vmem:[%s2811_s11 + $0x10] sm:$0xff] (!%p653_p2) }
   0xf   : > { %2314 = vmatprep.subr.bf16.mxu0 (!%p653_p2), %v2401_v3  ;;  %2207 = vmatprep.mubr.msk.f32.mxu0 (!%p653_p2), %vm2402_vm0, %v2403_v6  ;;  %s2838_s26 = sld [smem:[#allocation2_spill]] (!%p653_p2)  ;;  %s2839_s24 = sld [smem:[#allocation6_spill]] (!%p653_p2)  ;;  %v2321_v32 = vpack.c.bf16 (!%p653_p2), %v992_v31, %v991_v30  ;;  %v994_v34 = vld [vmem:[%s2811_s11 + $0x18] sm:$0xff] (!%p653_p2)  ;;  %v912_v35 = vld [vmem:[%s2809_s9] sm:$0xff] (!%p653_p2)  ;;  %v913_v37 = vld [vmem:[%s2809_s9 + $0x8] sm:$0xff] (!%p653_p2)  ;;  %vm1075_vm3 = vcmask (!%p653_p2), 64512  }
  0x10   : > { %v2324_v36 = vpack.c.bf16 (!%p653_p2), %v994_v34, %v993_v33  ;;  %s2841_s27 = sld [smem:[#allocation3_spill]] (!%p653_p2)  ;;  %v914_v38 = vld [vmem:[%s2809_s9 + $0x10] sm:$0xff] (!%p653_p2)  ;;  %v915_v39 = vld [vmem:[%s2809_s9 + $0x18] sm:$0xff] (!%p653_p2)  ;;  %v2315_v40 = vpack.c.bf16 (!%p653_p2), %v913_v37, %v912_v35  ;;  %v894_v49 = vld [vmem:[%s2808_s8] sm:$0x1] (!%p653_p2)  ;;  %s2406_s28 = smov (!%p653_p2), 104  }
  0x11   : > { %v2318_v42 = vpack.c.bf16 (!%p653_p2), %v915_v39, %v914_v38  ;;  %v2103_v52 = vld [vmem:[%s2812_s12] ss:$0 sm:$0xff] (!%p653_p2)  ;;  %vm1152_vm4 = vcmask (!%p653_p2), 57344   ;;  %s2407_s1 = smov (!%p653_p2), 88   ;;  %s2410_s6 = smov (!%p653_p2), 72   ;;  %vm1748_vm5 = vcmask (!%p653_p2), 130048  }
  0x12   : > { %2316 = vmatpush3.bf16.msra.mxu0 (!%p653_p2), %v2315_v40  ;;  %v916_v56 = vld [vmem:[%s2810_s10] sm:$0x1] (!%p653_p2)  ;;  %vm1750_vm6 = vcmask (!%p653_p2), 195584   ;;  %vm1936_vm7 = vcmask (!%p653_p2), 523264  }
  0x13   : > { %v735_v0 = vld [vmem:[%s2836_s5] sm:$0xff] (!%p653_p2)  ;;  %v736_v1 = vld [vmem:[%s2836_s5 + $0x8] sm:$0xff] (!%p653_p2)  ;;  %v737_v2 = vld [vmem:[%s2836_s5 + $0x10] sm:$0xff] (!%p653_p2)  ;;  %2317 = vmatprep.subr.bf16.mxu0 (!%p653_p2), %v2401_v3 }
  0x14   : > { %v2303_v4 = vpack.c.bf16 (!%p653_p2), %v736_v1, %v735_v0  ;;  %v738_v5 = vld [vmem:[%s2836_s5 + $0x18] sm:$0xff] (!%p653_p2)  ;;  %v814_v8 = vld [vmem:[%s2837_s3] sm:$0xff] (!%p653_p2)  ;;  %v815_v9 = vld [vmem:[%s2837_s3 + $0x8] sm:$0xff] (!%p653_p2) }
  0x15   : > { %v2306_v7 = vpack.c.bf16 %v738_v5, %v737_v2  ;;  %s2845_s30 = smov (!%p719_p3, %s2094_s30), 1  ;;  %v2309_v11 = vpack.c.bf16 %v815_v9, %v814_v8  ;;  %v816_v12 = vld [vmem:[%s2837_s3 + $0x10] sm:$0xff]  ;;  %v817_v13 = vld [vmem:[%s2837_s3 + $0x18] sm:$0xff]  ;;  %v739_v15 = vld [vmem:[%s2839_s24] sm:$0x1]  ;;  %s2843_s3 = sld [smem:[#allocation4_spill]] }
  0x16   : > { %2304 = vmatpush3.bf16.msra.mxu1 %v2303_v4  ;;  %s721_s2 = scalar_lea.vmem %s2838_s26, %s2845_s30  ;;  %v2312_v14 = vpack.c.bf16 %v817_v13, %v816_v12  ;;  %s2840_s26 = sld [smem:[#allocation8_spill]]  ;;  %2319 = vmatpush3.bf16.msra.mxu0 %v2318_v42 }
  0x17   : > { %2305 = vmatprep.subr.bf16.mxu1 %v2401_v3  ;;  %v732_v10 = vld [vmem:[%s721_s2] sm:$0x1]  ;;  %s2099_s25 = sshll.u32 %s2845_s30, 3  ;;  %2221 = vmatprep.subr.mxu0 %v2403_v6  ;;  %s2409_s2 = smov 80  }
  0x18   : > { %s725_s7 = scalar_lea.vmem %s2841_s27, %s2099_s25  ;;  %s2842_s25 = sld [smem:[#allocation9_spill]] }
  0x19   : > { %v733_v41 = vld [vmem:[%s725_s7] sm:$0xff]  ;;  %s2404_s27 = smov 120   ;;  %s2405_s7 = smov 112  }
  0x1a   : > { %2307 = vmatpush3.bf16.msra.mxu1 %v2306_v7 }
  0x1b   : > { %2308 = vmatprep.subr.bf16.mxu1 %v2401_v3 }
  0x1c   : > { %v818_v19 = vld [vmem:[%s2840_s26] sm:$0x1]  ;;  %s2408_s26 = smov 96  }
  0x1d   : > { %2186 = vmatmul.mubr.msk.f32.vlgmr.msra.gmra.mrb[0].mxu1 %vm740_vm1, %v732_v10 }
  0x1e   : > { %2310 = vmatpush3.bf16.msra.mxu1 %v2309_v11  ;;  %2196 = vmatprep.mubr.msk.f32.mxu1 %vm2402_vm0, %v2403_v6  ;;  %v893_v47 = vld [vmem:[%s2842_s25] sm:$0x1]  ;;  %s728_s25 = scalar_lea.vmem %s2843_s3, %s2845_s30 }
  0x1f   : > { %2311 = vmatprep.subr.bf16.mxu1 %v2401_v3  ;;  %v734_v4 = vld [vmem:[%s728_s25] sm:$0x1]  ;;  %s2411_s25 = smov 8  }
  0x22   : > { %2313 = vmatpush3.bf16.msra.mxu1 %v2312_v14 }
  0x23   : > { %2320 = vmatprep.subr.bf16.mxu1 %v2401_v3 }
  0xf0   : > { %v810_v16 = vpop.f32.mrb[0].mxu1 }
  0xf1   : > { %v811_v17 = vadd.f32 %v810_v16, %v739_v15  ;;  %v2187_v18 = vpop.f32.mrb[1].mxu1 }
  0xf3   : > { %2197 = vmatmul.mubr.msk.f32.vlgmr.msra.gmra.mrb[2].mxu1 %vm740_vm1, %v811_v17 }
  0xf4   : > { %2218 = vmatprep.mubr.msk.f32.mxu1 %vm2402_vm0, %v2403_v6  ;;  %2322 = vmatpush3.bf16.msra.mxu1 %v2321_v32 }
  0xf5   : > { %2323 = vmatprep.subr.bf16.mxu1 %v2401_v3 }
  0xf8   : > { %2325 = vmatpush3.bf16.msra.mxu1 %v2324_v36 }
  0xf9   : > { %2226 = vmatprep.subr.mxu1 %v2403_v6 }
  0xfb   : > { %2219 = vmatmul.mubr.msk.f32.vlgmr.msra.gmra.mrb[4].mxu1 %vm740_vm1, %v733_v41 }
  0xfc   : > { %2228 = vmatprep.mubr.msk.f32.mxu1 %vm2402_vm0, %v2403_v6 }
 0x1c6   : > { %v888_v20 = vpop.f32.mrb[2].mxu1 }
 0x1c7   : > { %v889_v21 = vadd.f32 %v888_v20, %v818_v19  ;;  %v2198_v22 = vpop.f32.mrb[3].mxu1 }
 0x1c9   : > { %v892_v23 = vadd.f32 %v889_v21, %v732_v10 }
 0x1cb   : > { %v896_v24 = vsel %vm895_vm2, %v892_v23, 0.0 }
 0x1cc   : > { %897 = vadd.xlane.f32.xlu0 %v896_v24 }
 0x1ce   : > { %v1071_v53 = vpop.f32.mrb[4].mxu1 }
 0x1cf   : > { %v2646_v54 = vadd.f32 %v2103_v52, %v1071_v53  ;;  %v2220_v55 = vpop.f32.mrb[5].mxu1 }
 0x1d1   : > { %1242 = vrot.lane.b32.xlu1 %v2646_v54, %s2404_s27 }
 0x1d5   : > { %1572 = vrot.lane.b32.xlu1 %v2646_v54, %s2406_s28 }
 0x243   : > { %v1243_v61 = vpop.permute.xlu1 %1242 }
 0x247   : > { %v1573_v62 = vpop.permute.xlu1 %1572 }
 0x259   : > { %v898_v25 = vpop.xlane.xlu0 %897 }
 0x25a   : > { %v900_v26 = vmul.f32 0.03125, %v898_v25 }
 0x25c   : > { %v901_v27 = vsub.f32 %v892_v23, %v900_v26 }
 0x25e   : > { %v902_v28 = vmul.f32 %v901_v27, %v901_v27 }
 0x260   : > { %v903_v29 = vsel %vm895_vm2, %v902_v28, 0.0 }
 0x261   : > { %904 = vadd.xlane.f32.xlu0 %v903_v29 }
 0x277   : > { %1407 = vrot.lane.b32.xlu0 %v2646_v54, %s2405_s7 }
 0x2ee   : > { %v905_v43 = vpop.xlane.xlu0 %904 }
 0x2ef   : > { %v906_v44 = vmul.f32 0.03125, %v905_v43 }
 0x2f1   : > { %v907_v45 = vadd.f32 1e-05, %v906_v44 }
 0x2f2   : > { %v1408_v0 = vpop.permute.xlu0 %1407 }
 0x2f3   : > { %2371 = vrsqrt.f32 %v907_v45 }
 0x2fd   : > { %v2372_v46 = vpop.eup %2371 }
 0x2fe   : > { %v909_v48 = vmul.f32 %v2372_v46, %v901_v27 }
 0x300   : > { %v910_v50 = vmul.f32 %v909_v48, %v893_v47 }
 0x302   : > { %v2637_v51 = vadd.f32 %v910_v50, %v894_v49 }
 0x304   : > { %2208 = vmatmul.mubr.msk.f32.vlgmr.msra.gmra.mrb[0].mxu0 %vm740_vm1, %v2637_v51 }
 0x305   : > { %2223 = vmatprep.mubr.msk.f32.mxu0 %vm2402_vm0, %v2403_v6  ;;  %2222 = vmatpush3.xpose.msk.msra.mxu0 %vm1075_vm3, %v2646_v54 }
 0x306   : > { %2231 = vmatprep.subr.mxu0 %v2403_v6 }
 0x3d7   : > { %v986_v57 = vpop.f32.mrb[0].mxu0 }
 0x3d8   : > { %v987_v58 = vadd.f32 %v986_v57, %v916_v56  ;;  %v2209_v59 = vpop.f32.mrb[1].mxu0 }
 0x3da   : > { %v990_v60 = vmul.f32 0.35355338, %v987_v58 }
 0x3dc   : > { %1240 = vrot.lane.b32.xlu1 %v990_v60, %s2404_s27  ;;  %2224 = vmatmul.mubr.msk.f32.vlgmr.msra.gmra.mrb[2].mxu0 %vm1075_vm3, %v990_v60 }
 0x3dd   : > { %2232 = vmatpush3.xpose.msk.msra.mxu0 %vm1075_vm3, %v1243_v61  ;;  %2233 = vmatprep.mubr.msk.f32.mxu0 %vm2402_vm0, %v2403_v6  ;;  %v1752_v61 = vld [vmem:[%s2813_s13] sm:$0xff] }
 0x3de   : > { %2241 = vmatprep.subr.mxu0 %v2403_v6 }
 0x3e0   : > { %1405 = vrot.lane.b32.xlu1 %v990_v60, %s2405_s7 }
 0x3e4   : > { %1570 = vrot.lane.b32.xlu1 %v990_v60, %s2406_s28 }
 0x44e   : > { %v1241_v63 = vpop.permute.xlu1 %1240 }
 0x44f   : > { %2234 = vmatmul.mubr.msk.f32.vlgmr.msra.gmra.mrb[4].mxu0 %vm1075_vm3, %v1241_v63 }
 0x450   : > { %2242 = vmatpush3.xpose.msk.msra.mxu0 %vm1075_vm3, %v1408_v0  ;;  %2243 = vmatprep.mubr.msk.f32.mxu0 %vm2402_vm0, %v2403_v6  ;;  %v1754_v0 = vld [vmem:[%s2813_s13 + $0x10] sm:$0xff] }
 0x451   : > { %2251 = vmatprep.subr.mxu0 %v2403_v6 }
 0x452   : > { %v1406_v1 = vpop.permute.xlu1 %1405 }
 0x453   : > { %2244 = vmatmul.mubr.msk.f32.vlgmr.msra.gmra.mrb[6].mxu0 %vm1075_vm3, %v1406_v1  ;;  %v1755_v1 = vld [vmem:[%s2813_s13 + $0x18] sm:$0xff] }
 0x454   : > { %2252 = vmatpush3.xpose.msk.msra.mxu0 %vm1075_vm3, %v1573_v62  ;;  %2253 = vmatprep.mubr.msk.f32.mxu0 %vm2402_vm0, %v2403_v6  ;;  %v1753_v62 = vld [vmem:[%s2813_s13 + $0x8] sm:$0xff] }
 0x455   : > { %2326 = vmatprep.subr.bf16.mxu0 %v2401_v3  ;;  %v2327_v63 = vpack.c.bf16 %v1753_v62, %v1752_v61 }
 0x456   : > { %v1571_v2 = vpop.permute.xlu1 %1570 }
 0x457   : > { %2254 = vmatmul.mubr.msk.f32.vlgmr.msra.gmra.mrb[8].mxu0 %vm1075_vm3, %v1571_v2  ;;  %v2330_v2 = vpack.c.bf16 %v1755_v1, %v1754_v0 }
 0x458   : > { %2269 = vmatprep.mubr.msk.f32.mxu0 %vm2402_vm0, %v2403_v6  ;;  %2328 = vmatpush3.bf16.msra.mxu0 %v2327_v63 }
 0x459   : > { %2329 = vmatprep.subr.bf16.mxu0 %v2401_v3 }
 0x45c   : > { %2331 = vmatpush3.bf16.msra.mxu0 %v2330_v2 }
 0x45d   : > { %2338 = vmatprep.subr.bf16.mxu0 %v2401_v3 }
 0x4af   : > { %v1148_v5 = vpop.f32.mrb[2].mxu0 }
 0x4b0   : > { %v1149_v7 = vadd.f32 %v1148_v5, %v734_v4  ;;  %v2225_v8 = vpop.f32.mrb[3].mxu0 }
 0x4b2   : > { %v1153_v9 = vsel %vm1152_vm4, %v1149_v7, -inf }
 0x4b3   : > { %1154 = vmax.xlane.f32.xlu1 %v1153_v9 }
 0x522   : > { %v1314_v10 = vpop.f32.mrb[4].mxu0 }
 0x523   : > { %v1315_v11 = vadd.f32 %v1314_v10, %v734_v4  ;;  %v2235_v12 = vpop.f32.mrb[5].mxu0 }
 0x525   : > { %v1318_v13 = vsel %vm1152_vm4, %v1315_v11, -inf }
 0x526   : > { %1319 = vmax.xlane.f32.xlu0 %v1318_v13  ;;  %v1479_v14 = vpop.f32.mrb[6].mxu0 }
 0x527   : > { %v1480_v15 = vadd.f32 %v1479_v14, %v734_v4  ;;  %v2245_v16 = vpop.f32.mrb[7].mxu0 }
 0x529   : > { %v1483_v17 = vsel %vm1152_vm4, %v1480_v15, -inf }
 0x52a   : > { %1484 = vmax.xlane.f32.xlu1 %v1483_v17  ;;  %v1644_v18 = vpop.f32.mrb[8].mxu0  ;;  %v1756_v17 = vld [vmem:[%s2814_s14] sm:$0x1] }
 0x52b   : > { %v1645_v19 = vadd.f32 %v1644_v18, %v734_v4  ;;  %v2255_v20 = vpop.f32.mrb[9].mxu0 }
 0x52d   : > { %v1648_v21 = vsel %vm1152_vm4, %v1645_v19, -inf }
 0x52e   : > { %1649 = vmax.xlane.f32.xlu1 %v1648_v21 }
 0x53f   : > { %1329 = vrot.lane.b32.xlu1 %v2646_v54, %s2407_s1  ;;  %s2412_s1 = smov 16  }
 0x540   : > { %v1155_v22 = vpop.xlane.xlu1 %1154 }
 0x541   : > { %v1156_v23 = vsub.f32 %v1149_v7, %v1155_v22 }
 0x543   : > { %v1157_v24 = vmul.f32 1.442695, %v1156_v23 }
 0x545   : > { %2373 = vpow2.f32 %v1157_v24 }
 0x54f   : > { %v2374_v25 = vpop.eup %2373 }
 0x550   : > { %v1159_v26 = vsel %vm1152_vm4, %v2374_v25, 0.0 }
 0x551   : > { %1160 = vadd.xlane.f32.xlu0 %v1159_v26 }
 0x567   : > { %1164 = vrot.lane.b32.xlu0 %v2646_v54, %s2408_s26  ;;  %s2413_s26 = smov 24  }
 0x5b3   : > { %v1320_v27 = vpop.xlane.xlu0 %1319 }
 0x5b4   : > { %v1321_v28 = vsub.f32 %v1315_v11, %v1320_v27 }
 0x5b6   : > { %v1322_v29 = vmul.f32 1.442695, %v1321_v28  ;;  %v1849_v28 = vld [vmem:[%s2817_s17 + $0x8] sm:$0xff] }
 0x5b7   : > { %v1485_v30 = vpop.xlane.xlu1 %1484 }
 0x5b8   : > { %2375 = vpow2.f32 %v1322_v29  ;;  %v1486_v31 = vsub.f32 %v1480_v15, %v1485_v30  ;;  %v1851_v30 = vld [vmem:[%s2817_s17 + $0x18] sm:$0xff] }
 0x5ba   : > { %v1487_v32 = vmul.f32 1.442695, %v1486_v31 }
 0x5bb   : > { %v1650_v33 = vpop.xlane.xlu1 %1649 }
 0x5bc   : > { %2377 = vpow2.f32 %v1487_v32  ;;  %v1651_v34 = vsub.f32 %v1645_v19, %v1650_v33  ;;  %v1927_v32 = vld [vmem:[%s2819_s19] sm:$0xff]  ;;  %v1928_v33 = vld [vmem:[%s2819_s19 + $0x8] sm:$0xff] }
 0x5be   : > { %v1652_v35 = vmul.f32 1.442695, %v1651_v34  ;;  %v1929_v34 = vld [vmem:[%s2819_s19 + $0x10] sm:$0xff] }
 0x5bf   : > { %v1330_v46 = vpop.permute.xlu1 %1329 }
 0x5c0   : > { %2379 = vpow2.f32 %v1652_v35  ;;  %v2339_v35 = vpack.c.bf16 %v1928_v33, %v1927_v32 }
 0x5c2   : > { %v2376_v36 = vpop.eup %2375 }
 0x5c3   : > { %v1324_v37 = vsel %vm1152_vm4, %v2376_v36, 0.0 }
 0x5c4   : > { %1325 = vadd.xlane.f32.xlu1 %v1324_v37 }
 0x5c6   : > { %v2378_v38 = vpop.eup %2377 }
 0x5c7   : > { %v1489_v39 = vsel %vm1152_vm4, %v2378_v38, 0.0 }
 0x5c8   : > { %1490 = vadd.xlane.f32.xlu0 %v1489_v39  ;;  %v1932_v39 = vld [vmem:[%s2819_s19 + $0x28] sm:$0xff] }
 0x5ca   : > { %v2380_v40 = vpop.eup %2379 }
 0x5cb   : > { %v1654_v41 = vsel %vm1152_vm4, %v2380_v40, 0.0 }
 0x5cc   : > { %1655 = vadd.xlane.f32.xlu1 %v1654_v41 }
 0x5dd   : > { %1494 = vrot.lane.b32.xlu1 %v2646_v54, %s2409_s2 }
 0x5de   : > { %v1161_v42 = vpop.xlane.xlu0 %1160  ;;  %1659 = vrot.lane.b32.xlu0 %v2646_v54, %s2410_s6  ;;  %s731_s6 = scalar_lea.vmem %s2823_s23, %s2845_s30 }
 0x5df   : > { %2381 = vrcp.f32 %v1161_v42 }
 0x5e2   : > { %v1165_v43 = vpop.permute.xlu0 %1164 }
 0x5e3   : > { %2227 = vmatpush3.msra.mxu1 %v1165_v43 }
 0x5e4   : > { %2236 = vmatprep.subr.mxu1 %v2403_v6 }
 0x5e9   : > { %v2382_v44 = vpop.eup %2381 }
 0x5ea   : > { %v1163_v45 = vmul.f32 %v2382_v44, %v2374_v25 }
 0x5ec   : > { %2229 = vmatmul.mubr.msk.f32.vlgmr.msra.gmra.mrb[6].mxu1 %vm1075_vm3, %v1163_v45  ;;  %v1831_v45 = vld [vmem:[%s2815_s15] sm:$0x1] }
 0x5ed   : > { %2237 = vmatpush3.msra.mxu1 %v1330_v46  ;;  %2238 = vmatprep.mubr.msk.f32.mxu1 %vm2402_vm0, %v2403_v6 }
 0x5ee   : > { %2246 = vmatprep.subr.mxu1 %v2403_v6 }
 0x651   : > { %v1326_v47 = vpop.xlane.xlu1 %1325 }
 0x652   : > { %2383 = vrcp.f32 %v1326_v47  ;;  %v1832_v47 = vld [vmem:[%s2816_s16] sm:$0x1] }
 0x655   : > { %v1491_v48 = vpop.xlane.xlu0 %1490 }
 0x656   : > { %2385 = vrcp.f32 %v1491_v48 }
 0x659   : > { %v1656_v49 = vpop.xlane.xlu1 %1655  ;;  %v1660_v56 = vpop.permute.xlu0 %1659 }
 0x65a   : > { %2387 = vrcp.f32 %v1656_v49 }
 0x65c   : > { %v2384_v50 = vpop.eup %2383 }
 0x65d   : > { %v1328_v52 = vmul.f32 %v2384_v50, %v2376_v36  ;;  %v1495_v53 = vpop.permute.xlu1 %1494  ;;  %v1930_v36 = vld [vmem:[%s2819_s19 + $0x18] sm:$0xff] }
 0x65e   : > { %v2342_v37 = vpack.c.bf16 %v1930_v36, %v1929_v34  ;;  %v1934_v50 = vld [vmem:[%s2819_s19 + $0x38] sm:$0xff] }
 0x65f   : > { %2239 = vmatmul.mubr.msk.f32.vlgmr.msra.gmra.mrb[8].mxu1 %vm1075_vm3, %v1328_v52 }
 0x660   : > { %v2386_v54 = vpop.eup %2385  ;;  %2247 = vmatpush3.msra.mxu1 %v1495_v53  ;;  %2248 = vmatprep.mubr.msk.f32.mxu1 %vm2402_vm0, %v2403_v6  ;;  %v1852_v53 = vld [vmem:[%s2818_s18] sm:$0x1] }
 0x661   : > { %v1493_v55 = vmul.f32 %v2386_v54, %v2378_v38  ;;  %2256 = vmatprep.subr.mxu1 %v2403_v6  ;;  %v1931_v38 = vld [vmem:[%s2819_s19 + $0x20] sm:$0xff] }
 0x663   : > { %2249 = vmatmul.mubr.msk.f32.vlgmr.msra.gmra.mrb[10].mxu1 %vm1075_vm3, %v1493_v55 }
 0x664   : > { %v2388_v57 = vpop.eup %2387  ;;  %2257 = vmatpush3.msra.mxu1 %v1660_v56  ;;  %2258 = vmatprep.mubr.msk.f32.mxu1 %vm2402_vm0, %v2403_v6 }
 0x665   : > { %v1658_v58 = vmul.f32 %v2388_v57, %v2380_v40  ;;  %2332 = vmatprep.subr.bf16.mxu1 %v2401_v3  ;;  %v2345_v40 = vpack.c.bf16 %v1932_v39, %v1931_v38 }
 0x667   : > { %2259 = vmatmul.mubr.msk.f32.vlgmr.msra.gmra.mrb[12].mxu1 %vm1075_vm3, %v1658_v58  ;;  %v1935_v58 = vld [vmem:[%s2820_s20] sm:$0x1] }
 0x668   : > { %2280 = vmatprep.mubr.msk.f32.mxu1 %vm2402_vm0, %v2403_v6 }
 0x6bf   : > { %v1236_v59 = vpop.f32.mrb[6].mxu1 }
 0x6c0   : > { %v2230_v60 = vpop.f32.mrb[7].mxu1 }
 0x732   : > { %v1401_v4 = vpop.f32.mrb[8].mxu1 }
 0x733   : > { %1736 = vrot.lane.b32.xlu1 %v1401_v4, %s2411_s25  ;;  %v2240_v5 = vpop.f32.mrb[9].mxu1 }
 0x736   : > { %v1566_v7 = vpop.f32.mrb[10].mxu1 }
 0x737   : > { %1740 = vrot.lane.b32.xlu0 %v1566_v7, %s2412_s1  ;;  %v2250_v8 = vpop.f32.mrb[11].mxu1 }
 0x73a   : > { %v1731_v9 = vpop.f32.mrb[12].mxu1 }
 0x73b   : > { %1744 = vrot.lane.b32.xlu1 %v1731_v9, %s2413_s26  ;;  %v2260_v10 = vpop.f32.mrb[13].mxu1 }
 0x7a5   : > { %v1737_v11 = vpop.permute.xlu1 %1736 }
 0x7a6   : > { %v1747_v13 = vsel %vm1075_vm3, %v1236_v59, %v1737_v11  ;;  %v2011_v11 = vld [vmem:[%s2821_s21] sm:$0x1] }
 0x7a9   : > { %v1741_v12 = vpop.permute.xlu0 %1740 }
 0x7aa   : > { %v1749_v14 = vsel %vm1748_vm5, %v1747_v13, %v1741_v12  ;;  %v2012_v13 = vld [vmem:[%s2822_s22] sm:$0x1] }
 0x7ad   : > { %v1745_v15 = vpop.permute.xlu1 %1744 }
 0x7ae   : > { %v1751_v16 = vsel %vm1750_vm6, %v1749_v14, %v1745_v15 }
 0x7af   : > { %2270 = vmatmul.mubr.msk.f32.vlgmr.msra.gmra.mrb[10].mxu0 %vm740_vm1, %v1751_v16 }
 0x7b0   : > { %2299 = vmatprep.mubr.msk.f32.mxu0 %vm2402_vm0, %v2403_v6  ;;  %v1848_v6 = vld [vmem:[%s2817_s17] sm:$0xff]  ;;  %2340 = vmatpush3.bf16.msra.mxu0 %v2339_v35 }
 0x7b1   : > { %v2333_v29 = vpack.c.bf16 %v1849_v28, %v1848_v6  ;;  %2341 = vmatprep.subr.bf16.mxu0 %v2401_v3 }
 0x7b3   : > { %2334 = vmatpush3.bf16.msra.mxu1 %v2333_v29 }
 0x7b4   : > { %2335 = vmatprep.subr.bf16.mxu1 %v2401_v3  ;;  %2343 = vmatpush3.bf16.msra.mxu0 %v2342_v37 }
 0x7b5   : > { %2344 = vmatprep.subr.bf16.mxu0 %v2401_v3 }
 0x7b8   : > { %2346 = vmatpush3.bf16.msra.mxu0 %v2345_v40 }
 0x7b9   : > { %2347 = vmatprep.subr.bf16.mxu0 %v2401_v3  ;;  %v1933_v3 = vld [vmem:[%s2819_s19 + $0x30] sm:$0xff] }
 0x7ba   : > { %v2348_v52 = vpack.c.bf16 %v1934_v50, %v1933_v3 }
 0x7bc   : > { %2349 = vmatpush3.bf16.msra.mxu0 %v2348_v52 }
 0x882   : > { %v1826_v18 = vpop.f32.mrb[10].mxu0 }
 0x883   : > { %v1827_v19 = vadd.f32 %v1826_v18, %v1756_v17  ;;  %v2271_v20 = vpop.f32.mrb[11].mxu0 }
 0x885   : > { %v1830_v21 = vadd.f32 %v1827_v19, %v2637_v51  ;;  %v1850_v51 = vld [vmem:[%s2817_s17 + $0x10] sm:$0xff] }
 0x886   : > { %v2336_v31 = vpack.c.bf16 %v1851_v30, %v1850_v51 }
 0x887   : > { %v1833_v22 = vsel %vm895_vm2, %v1830_v21, 0.0 }
 0x888   : > { %1834 = vadd.xlane.f32.xlu0 %v1833_v22  ;;  %2337 = vmatpush3.bf16.msra.mxu1 %v2336_v31 }
 0x915   : > { %v1835_v23 = vpop.xlane.xlu0 %1834 }
 0x916   : > { %v1836_v24 = vmul.f32 0.03125, %v1835_v23 }
 0x918   : > { %v1837_v25 = vsub.f32 %v1830_v21, %v1836_v24 }
 0x91a   : > { %v1838_v26 = vmul.f32 %v1837_v25, %v1837_v25 }
 0x91c   : > { %v1839_v27 = vsel %vm895_vm2, %v1838_v26, 0.0 }
 0x91d   : > { %1840 = vadd.xlane.f32.xlu1 %v1839_v27 }
 0x9aa   : > { %v1841_v41 = vpop.xlane.xlu1 %1840 }
 0x9ab   : > { %v1842_v42 = vmul.f32 0.03125, %v1841_v41 }
 0x9ad   : > { %v1843_v43 = vadd.f32 1e-05, %v1842_v42 }
 0x9af   : > { %2389 = vrsqrt.f32 %v1843_v43 }
 0x9b9   : > { %v2390_v44 = vpop.eup %2389 }
 0x9ba   : > { %v1845_v46 = vmul.f32 %v2390_v44, %v1837_v25 }
 0x9bc   : > { %v1846_v48 = vmul.f32 %v1845_v46, %v1831_v45 }
 0x9be   : > { %v1847_v49 = vadd.f32 %v1846_v48, %v1832_v47 }
 0x9c0   : > { %2281 = vmatmul.mubr.msk.f32.vlgmr.msra.gmra.mrb[14].mxu1 %vm740_vm1, %v1847_v49 }
 0xa93   : > { %v1922_v54 = vpop.f32.mrb[14].mxu1 }
 0xa94   : > { %v1923_v55 = vadd.f32 %v1922_v54, %v1852_v53  ;;  %v2282_v56 = vpop.f32.mrb[15].mxu1 }
 0xa96   : > { %v1926_v57 = vmax.f32 %v1923_v55, 0.0 }
 0xa98   : > { %2300 = vmatmul.mubr.msk.f32.vlgmr.msra.gmra.mrb[12].mxu0 %vm1936_vm7, %v1926_v57 }
 0xb6b   : > { %v2006_v59 = vpop.f32.mrb[12].mxu0 }
 0xb6c   : > { %v2007_v60 = vadd.f32 %v2006_v59, %v1935_v58  ;;  %v2301_v61 = vpop.f32.mrb[13].mxu0 }
 0xb6e   : > { %v2010_v62 = vadd.f32 %v2007_v60, %v1847_v49 }
 0xb70   : > { %v2013_v63 = vsel %vm895_vm2, %v2010_v62, 0.0 }
 0xb71   : > { %2014 = vadd.xlane.f32.xlu0 %v2013_v63 }
 0xbfe   : > { %v2015_v0 = vpop.xlane.xlu0 %2014 }
 0xbff   : > { %v2016_v1 = vmul.f32 0.03125, %v2015_v0 }
 0xc01   : > { %v2017_v2 = vsub.f32 %v2010_v62, %v2016_v1 }
 0xc03   : > { %v2018_v4 = vmul.f32 %v2017_v2, %v2017_v2 }
 0xc05   : > { %v2019_v5 = vsel %vm895_vm2, %v2018_v4, 0.0 }
 0xc06   : > { %2020 = vadd.xlane.f32.xlu0 %v2019_v5 }
 0xc93   : > { %v2021_v7 = vpop.xlane.xlu0 %2020 }
 0xc94   : > { %v2022_v8 = vmul.f32 0.03125, %v2021_v7 }
 0xc96   : > { %v2023_v9 = vadd.f32 1e-05, %v2022_v8 }
 0xc98   : > { %2391 = vrsqrt.f32 %v2023_v9 }
 0xca2   : > { %v2392_v10 = vpop.eup %2391 }
 0xca3   : > { %v2025_v12 = vmul.f32 %v2392_v10, %v2017_v2 }
 0xca5   : > { %v2026_v14 = vmul.f32 %v2025_v12, %v2011_v11 }
 0xca7   : > { %v2027_v15 = vadd.f32 %v2026_v14, %v2012_v13 }
 0xca9   : > { %2028 = vst.msk [vmem:[%s731_s6] sm:$0x1] %vm895_vm2, %v2027_v15 }
 0xcaa PF: > { %s33_s4 = sadd.s32 1, %s2399_s4  }
 0xcab   : > { %p30_p4 = scmp.ge.s32.totalorder %s33_s4, 4  }
 0xcad   :  { %32 = sbr.rel (!%p30_p4) target bundleno = 9 (0x9), region = 148 }

</bundles_post_ra>
